<compile_context>
chip_gen: v6e
topology: v6e:2x2x1
jax: 0.10.0
libtpu: 0.0.40
codegen_flags: <defaults>
</compile_context>

<pallas_src>
import jax
import jax.numpy as jnp
import numpy as np
from jax.experimental import pallas as pl
from jax.experimental.pallas import tpu as pltpu

IN_DIM = 768            # fixed by the module (nn.Linear(768, intermediate_dim))
D = 256                 # intermediate_dim (small test size, multiple of 128)
NUM_FC_LAYERS = 2       # num_fc_layers
T_STEPS = 100           # denoising_time_steps
B = 8                   # batch
TB = 8                  # batch tile (== B here, one grid step)


def diffusion_fc_kernel(t_ref,                                  # SMEM (B,) int32 (scalar prefetch)
                        x_ref, emb_ref,
                        w_in_ref, s_in_ref, b_in_ref,
                        w_mid_ref, s_mid_ref, b_mid_ref,
                        w_out_ref, s_out_ref, b_out_ref,
                        o_ref):
    base = pl.program_id(0) * TB

    # Input projection: bf16 MXU feed (int8 weight upcast), f32 accumulate,
    # per-output-channel dequant scale, bias.
    h = jnp.dot(x_ref[...], w_in_ref[...].astype(jnp.bfloat16),
                preferred_element_type=jnp.float32)
    h = h * s_in_ref[...] + b_in_ref[...]

    # Fused time-embedding gather: 8 dynamic row slices from the VMEM table.
    rows = []
    for b in range(TB):
        t_b = jnp.clip(t_ref[base + b], 0, T_STEPS - 1)   # cheap scalar clamp
        rows.append(emb_ref[pl.ds(t_b, 1), :])            # (1, D) f32
    h = h + jnp.concatenate(rows, axis=0)

    # MidFC: num_layers x (Linear(D, D) -> ReLU), statically unrolled.
    for l in range(NUM_FC_LAYERS):
        h = jnp.dot(h.astype(jnp.bfloat16), w_mid_ref[l].astype(jnp.bfloat16),
                    preferred_element_type=jnp.float32)
        h = jnp.maximum(h * s_mid_ref[l] + b_mid_ref[l], 0.0)

    # Output projection: (TB, D) @ (D, 768); lane-dense f32 store (768 = 6*128).
    y = jnp.dot(h.astype(jnp.bfloat16), w_out_ref[...].astype(jnp.bfloat16),
                preferred_element_type=jnp.float32)
    o_ref[...] = (y * s_out_ref[...] + b_out_ref[...]).astype(o_ref.dtype)


@jax.jit
def diffusion_fc(x, t, qparams):
    (emb, w_in_q, s_in, b_in,
     w_mid_q, s_mid, b_mid,
     w_out_q, s_out, b_out) = qparams

    x_bf16 = x.astype(jnp.bfloat16)          # micro byte-shave: bf16 activations in
    bn = x.shape[0]
    grid = (pl.cdiv(bn, TB),)

    return pl.pallas_call(
        diffusion_fc_kernel,
        out_shape=jax.ShapeDtypeStruct((bn, IN_DIM), jnp.float32),
        grid_spec=pltpu.PrefetchScalarGridSpec(
            num_scalar_prefetch=1,            # t -> SMEM, also fed to index_maps
            grid=grid,
            in_specs=[
                pl.BlockSpec((TB, IN_DIM), lambda i, t: (i, 0)),               # x (bf16)
                pl.BlockSpec((T_STEPS, D), lambda i, t: (0, 0)),               # emb table (f32)
                pl.BlockSpec((IN_DIM, D), lambda i, t: (0, 0)),                # w_in (int8)
                pl.BlockSpec((1, D), lambda i, t: (0, 0)),                     # s_in (f32)
                pl.BlockSpec((1, D), lambda i, t: (0, 0)),                     # b_in (f32)
                pl.BlockSpec((NUM_FC_LAYERS, D, D), lambda i, t: (0, 0, 0)),   # w_mid (int8)
                pl.BlockSpec((NUM_FC_LAYERS, 1, D), lambda i, t: (0, 0, 0)),   # s_mid (f32)
                pl.BlockSpec((NUM_FC_LAYERS, 1, D), lambda i, t: (0, 0, 0)),   # b_mid (f32)
                pl.BlockSpec((D, IN_DIM), lambda i, t: (0, 0)),                # w_out (int8)
                pl.BlockSpec((1, IN_DIM), lambda i, t: (0, 0)),                # s_out (f32)
                pl.BlockSpec((1, IN_DIM), lambda i, t: (0, 0)),                # b_out (f32)
            ],
            out_specs=pl.BlockSpec((TB, IN_DIM), lambda i, t: (i, 0)),
        ),
        compiler_params=pltpu.CompilerParams(
            dimension_semantics=("arbitrary",)),   # don't megacore-shard at B=8
    )(t, x_bf16, emb, w_in_q, s_in, b_in, w_mid_q, s_mid, b_mid, w_out_q, s_out, b_out)


def init_params_f32(key):
    ks = jax.random.split(key, 7)
    s = 0.02
    emb = s * jax.random.normal(ks[0], (T_STEPS, D), jnp.float32)
    w_in = s * jax.random.normal(ks[1], (IN_DIM, D), jnp.float32)
    b_in = s * jax.random.normal(ks[2], (1, D), jnp.float32)
    w_mid = s * jax.random.normal(ks[3], (NUM_FC_LAYERS, D, D), jnp.float32)
    b_mid = s * jax.random.normal(ks[4], (NUM_FC_LAYERS, 1, D), jnp.float32)
    w_out = s * jax.random.normal(ks[5], (D, IN_DIM), jnp.float32)
    b_out = s * jax.random.normal(ks[6], (1, IN_DIM), jnp.float32)
    return emb, w_in, b_in, w_mid, b_mid, w_out, b_out


def quantize_per_channel(w):
    # Symmetric per-output-channel int8 over the contraction axis (axis=-2).
    s = jnp.max(jnp.abs(w), axis=-2, keepdims=True) / 127.0
    s = jnp.maximum(s, 1e-8)
    q = jnp.clip(jnp.round(w / s), -127, 127).astype(jnp.int8)
    return q, s.astype(jnp.float32)


def quantize_params(p):
    emb, w_in, b_in, w_mid, b_mid, w_out, b_out = p
    w_in_q, s_in = quantize_per_channel(w_in)
    w_mid_q, s_mid = quantize_per_channel(w_mid)
    w_out_q, s_out = quantize_per_channel(w_out)
    return (emb, w_in_q, s_in, b_in, w_mid_q, s_mid, b_mid, w_out_q, s_out, b_out)


def reference_quantized(x, t, qparams):
    # Mirrors the kernel's arithmetic exactly (int8->bf16 weights, bf16 MXU
    # inputs, f32 accumulation, per-channel scale, f32 bias/ReLU/embedding).
    (emb, w_in_q, s_in, b_in,
     w_mid_q, s_mid, b_mid,
     w_out_q, s_out, b_out) = qparams
    h = jnp.dot(x.astype(jnp.bfloat16), w_in_q.astype(jnp.bfloat16),
                preferred_element_type=jnp.float32)
    h = h * s_in + b_in + emb[t]
    for l in range(NUM_FC_LAYERS):
        h = jnp.dot(h.astype(jnp.bfloat16), w_mid_q[l].astype(jnp.bfloat16),
                    preferred_element_type=jnp.float32)
        h = jnp.maximum(h * s_mid[l] + b_mid[l], 0.0)
    y = jnp.dot(h.astype(jnp.bfloat16), w_out_q.astype(jnp.bfloat16),
                preferred_element_type=jnp.float32)
    return y * s_out + b_out


def reference_f32(x, t, p):
    # True float32 PyTorch DiffusionFC forward (golden reference).
    emb, w_in, b_in, w_mid, b_mid, w_out, b_out = p
    h = x @ w_in + b_in + emb[t]
    for l in range(NUM_FC_LAYERS):
        h = jnp.maximum(h @ w_mid[l] + b_mid[l], 0.0)
    return h @ w_out + b_out


if __name__ == "__main__":
    key = jax.random.PRNGKey(0)
    k_p, k_x, k_t = jax.random.split(key, 3)
    params_f32 = init_params_f32(k_p)
    qparams = quantize_params(params_f32)

    x = jax.random.normal(k_x, (B, IN_DIM), jnp.float32)
    t = jax.random.randint(k_t, (B,), 0, T_STEPS, jnp.int32)

    out = jax.block_until_ready(diffusion_fc(x, t, qparams))

    # 1) Exact-arithmetic check against a reference with identical mixed
    #    precision / quantisation (catches kernel bugs).
    ref_q = reference_quantized(x, t, qparams)
    np.testing.assert_allclose(np.asarray(out), np.asarray(ref_q),
                               rtol=2e-3, atol=2e-3)

    # 2) Accuracy check against the true f32 module (looser tolerance covers
    #    bf16 MXU inputs + per-channel int8 weight quantisation).
    ref_g = reference_f32(x, t, params_f32)
    np.testing.assert_allclose(np.asarray(out), np.asarray(ref_g),
                               rtol=5e-2, atol=2e-2)

    print("KERNEL_OK")
</pallas_src>

<mosaic_0001>
module attributes {stable_mosaic.version = 11 : i64} {
  func.func @diffusion_fc_kernel(%arg0: i32, %arg1: memref<8xi32, #tpu.memory_space<smem>>, %arg2: memref<8x768xbf16, #tpu.memory_space<vmem>>, %arg3: memref<100x256xf32, #tpu.memory_space<vmem>>, %arg4: memref<768x256xi8, #tpu.memory_space<vmem>>, %arg5: memref<1x256xf32, #tpu.memory_space<vmem>>, %arg6: memref<1x256xf32, #tpu.memory_space<vmem>>, %arg7: memref<2x256x256xi8, #tpu.memory_space<vmem>>, %arg8: memref<2x1x256xf32, #tpu.memory_space<vmem>>, %arg9: memref<2x1x256xf32, #tpu.memory_space<vmem>>, %arg10: memref<256x768xi8, #tpu.memory_space<vmem>>, %arg11: memref<1x768xf32, #tpu.memory_space<vmem>>, %arg12: memref<1x768xf32, #tpu.memory_space<vmem>>, %arg13: memref<8x768xf32, #tpu.memory_space<vmem>>) attributes {dimension_semantics = [#tpu.dimension_semantics<arbitrary>], iteration_bounds = array<i64: 1>, scalar_prefetch = 1 : i64, scratch_operands = 0 : i64, tpu.core_type = #tpu.core_type<tc>, window_params = [{transform_indices = @transform_0, window_bounds = array<i64: 8, 768>}, {pipeline_mode = #tpu.pipeline_mode<synchronous>, transform_indices = @transform_1, window_bounds = array<i64: 100, 256>}, {pipeline_mode = #tpu.pipeline_mode<synchronous>, transform_indices = @transform_2, window_bounds = array<i64: 768, 256>}, {pipeline_mode = #tpu.pipeline_mode<synchronous>, transform_indices = @transform_3, window_bounds = array<i64: 1, 256>}, {pipeline_mode = #tpu.pipeline_mode<synchronous>, transform_indices = @transform_4, window_bounds = array<i64: 1, 256>}, {pipeline_mode = #tpu.pipeline_mode<synchronous>, transform_indices = @transform_5, window_bounds = array<i64: 2, 256, 256>}, {pipeline_mode = #tpu.pipeline_mode<synchronous>, transform_indices = @transform_6, window_bounds = array<i64: 2, 1, 256>}, {pipeline_mode = #tpu.pipeline_mode<synchronous>, transform_indices = @transform_7, window_bounds = array<i64: 2, 1, 256>}, {pipeline_mode = #tpu.pipeline_mode<synchronous>, transform_indices = @transform_8, window_bounds = array<i64: 256, 768>}, {pipeline_mode = #tpu.pipeline_mode<synchronous>, transform_indices = @transform_9, window_bounds = array<i64: 1, 768>}, {pipeline_mode = #tpu.pipeline_mode<synchronous>, transform_indices = @transform_10, window_bounds = array<i64: 1, 768>}, {transform_indices = @transform_11, window_bounds = array<i64: 8, 768>}]} {
    %c8_i32 = arith.constant 8 : i32
    %0 = arith.muli %arg0, %c8_i32 : i32
    %c0 = arith.constant 0 : index
    %c0_0 = arith.constant 0 : index
    %1 = vector.load %arg2[%c0, %c0_0] : memref<8x768xbf16, #tpu.memory_space<vmem>>, vector<8x768xbf16>
    %c0_1 = arith.constant 0 : index
    %c0_2 = arith.constant 0 : index
    %2 = vector.load %arg4[%c0_1, %c0_2] : memref<768x256xi8, #tpu.memory_space<vmem>>, vector<768x256xi8>
    %3 = arith.sitofp %2 : vector<768x256xi8> to vector<768x256xbf16>
    %cst = arith.constant dense<0.000000e+00> : vector<8x256xf32>
    %4 = tpu.matmul %1, %3, %cst {dimension_numbers = #tpu.dot_dimension_numbers<[1], [0], [0], [1], [0, 0, 1, 1], [], []>} : vector<8x768xbf16>, vector<768x256xbf16>, vector<8x256xf32> -> vector<8x256xf32>
    %c0_3 = arith.constant 0 : index
    %c0_4 = arith.constant 0 : index
    %5 = vector.load %arg5[%c0_3, %c0_4] : memref<1x256xf32, #tpu.memory_space<vmem>>, vector<1x256xf32>
    %6 = vector.broadcast %5 : vector<1x256xf32> to vector<8x256xf32>
    %7 = arith.mulf %4, %6 : vector<8x256xf32>
    %c0_5 = arith.constant 0 : index
    %c0_6 = arith.constant 0 : index
    %8 = vector.load %arg6[%c0_5, %c0_6] : memref<1x256xf32, #tpu.memory_space<vmem>>, vector<1x256xf32>
    %9 = vector.broadcast %8 : vector<1x256xf32> to vector<8x256xf32>
    %10 = arith.addf %7, %9 : vector<8x256xf32>
    %c0_i32 = arith.constant 0 : i32
    %11 = arith.addi %0, %c0_i32 : i32
    %12 = arith.index_cast %11 : i32 to index
    %13 = memref.load %arg1[%12] : memref<8xi32, #tpu.memory_space<smem>>
    %c0_i32_7 = arith.constant 0 : i32
    %c99_i32 = arith.constant 99 : i32
    %14 = arith.maxsi %c0_i32_7, %13 : i32
    %15 = arith.minsi %c99_i32, %14 : i32
    %16 = arith.index_cast %15 : i32 to index
    %c0_8 = arith.constant 0 : index
    %17 = vector.load %arg3[%16, %c0_8] : memref<100x256xf32, #tpu.memory_space<vmem>>, vector<1x256xf32>
    %c1_i32 = arith.constant 1 : i32
    %18 = arith.addi %0, %c1_i32 : i32
    %19 = arith.index_cast %18 : i32 to index
    %20 = memref.load %arg1[%19] : memref<8xi32, #tpu.memory_space<smem>>
    %c0_i32_9 = arith.constant 0 : i32
    %c99_i32_10 = arith.constant 99 : i32
    %21 = arith.maxsi %c0_i32_9, %20 : i32
    %22 = arith.minsi %c99_i32_10, %21 : i32
    %23 = arith.index_cast %22 : i32 to index
    %c0_11 = arith.constant 0 : index
    %24 = vector.load %arg3[%23, %c0_11] : memref<100x256xf32, #tpu.memory_space<vmem>>, vector<1x256xf32>
    %c2_i32 = arith.constant 2 : i32
    %25 = arith.addi %0, %c2_i32 : i32
    %26 = arith.index_cast %25 : i32 to index
    %27 = memref.load %arg1[%26] : memref<8xi32, #tpu.memory_space<smem>>
    %c0_i32_12 = arith.constant 0 : i32
    %c99_i32_13 = arith.constant 99 : i32
    %28 = arith.maxsi %c0_i32_12, %27 : i32
    %29 = arith.minsi %c99_i32_13, %28 : i32
    %30 = arith.index_cast %29 : i32 to index
    %c0_14 = arith.constant 0 : index
    %31 = vector.load %arg3[%30, %c0_14] : memref<100x256xf32, #tpu.memory_space<vmem>>, vector<1x256xf32>
    %c3_i32 = arith.constant 3 : i32
    %32 = arith.addi %0, %c3_i32 : i32
    %33 = arith.index_cast %32 : i32 to index
    %34 = memref.load %arg1[%33] : memref<8xi32, #tpu.memory_space<smem>>
    %c0_i32_15 = arith.constant 0 : i32
    %c99_i32_16 = arith.constant 99 : i32
    %35 = arith.maxsi %c0_i32_15, %34 : i32
    %36 = arith.minsi %c99_i32_16, %35 : i32
    %37 = arith.index_cast %36 : i32 to index
    %c0_17 = arith.constant 0 : index
    %38 = vector.load %arg3[%37, %c0_17] : memref<100x256xf32, #tpu.memory_space<vmem>>, vector<1x256xf32>
    %c4_i32 = arith.constant 4 : i32
    %39 = arith.addi %0, %c4_i32 : i32
    %40 = arith.index_cast %39 : i32 to index
    %41 = memref.load %arg1[%40] : memref<8xi32, #tpu.memory_space<smem>>
    %c0_i32_18 = arith.constant 0 : i32
    %c99_i32_19 = arith.constant 99 : i32
    %42 = arith.maxsi %c0_i32_18, %41 : i32
    %43 = arith.minsi %c99_i32_19, %42 : i32
    %44 = arith.index_cast %43 : i32 to index
    %c0_20 = arith.constant 0 : index
    %45 = vector.load %arg3[%44, %c0_20] : memref<100x256xf32, #tpu.memory_space<vmem>>, vector<1x256xf32>
    %c5_i32 = arith.constant 5 : i32
    %46 = arith.addi %0, %c5_i32 : i32
    %47 = arith.index_cast %46 : i32 to index
    %48 = memref.load %arg1[%47] : memref<8xi32, #tpu.memory_space<smem>>
    %c0_i32_21 = arith.constant 0 : i32
    %c99_i32_22 = arith.constant 99 : i32
    %49 = arith.maxsi %c0_i32_21, %48 : i32
    %50 = arith.minsi %c99_i32_22, %49 : i32
    %51 = arith.index_cast %50 : i32 to index
    %c0_23 = arith.constant 0 : index
    %52 = vector.load %arg3[%51, %c0_23] : memref<100x256xf32, #tpu.memory_space<vmem>>, vector<1x256xf32>
    %c6_i32 = arith.constant 6 : i32
    %53 = arith.addi %0, %c6_i32 : i32
    %54 = arith.index_cast %53 : i32 to index
    %55 = memref.load %arg1[%54] : memref<8xi32, #tpu.memory_space<smem>>
    %c0_i32_24 = arith.constant 0 : i32
    %c99_i32_25 = arith.constant 99 : i32
    %56 = arith.maxsi %c0_i32_24, %55 : i32
    %57 = arith.minsi %c99_i32_25, %56 : i32
    %58 = arith.index_cast %57 : i32 to index
    %c0_26 = arith.constant 0 : index
    %59 = vector.load %arg3[%58, %c0_26] : memref<100x256xf32, #tpu.memory_space<vmem>>, vector<1x256xf32>
    %c7_i32 = arith.constant 7 : i32
    %60 = arith.addi %0, %c7_i32 : i32
    %61 = arith.index_cast %60 : i32 to index
    %62 = memref.load %arg1[%61] : memref<8xi32, #tpu.memory_space<smem>>
    %c0_i32_27 = arith.constant 0 : i32
    %c99_i32_28 = arith.constant 99 : i32
    %63 = arith.maxsi %c0_i32_27, %62 : i32
    %64 = arith.minsi %c99_i32_28, %63 : i32
    %65 = arith.index_cast %64 : i32 to index
    %c0_29 = arith.constant 0 : index
    %66 = vector.load %arg3[%65, %c0_29] : memref<100x256xf32, #tpu.memory_space<vmem>>, vector<1x256xf32>
    %67 = tpu.concatenate %17, %24, %31, %38, %45, %52, %59, %66 in 0 : vector<1x256xf32>, vector<1x256xf32>, vector<1x256xf32>, vector<1x256xf32>, vector<1x256xf32>, vector<1x256xf32>, vector<1x256xf32>, vector<1x256xf32> -> vector<8x256xf32>
    %68 = arith.addf %10, %67 : vector<8x256xf32>
    %69 = arith.truncf %68 : vector<8x256xf32> to vector<8x256xbf16>
    %c0_30 = arith.constant 0 : index
    %c0_31 = arith.constant 0 : index
    %c0_32 = arith.constant 0 : index
    %70 = vector.load %arg7[%c0_30, %c0_31, %c0_32] : memref<2x256x256xi8, #tpu.memory_space<vmem>>, vector<1x256x256xi8>
    %71 = vector.shape_cast %70 : vector<1x256x256xi8> to vector<256x256xi8>
    %72 = arith.sitofp %71 : vector<256x256xi8> to vector<256x256xbf16>
    %cst_33 = arith.constant dense<0.000000e+00> : vector<8x256xf32>
    %73 = tpu.matmul %69, %72, %cst_33 {dimension_numbers = #tpu.dot_dimension_numbers<[1], [0], [0], [1], [0, 0, 1, 1], [], []>} : vector<8x256xbf16>, vector<256x256xbf16>, vector<8x256xf32> -> vector<8x256xf32>
    %c0_34 = arith.constant 0 : index
    %c0_35 = arith.constant 0 : index
    %c0_36 = arith.constant 0 : index
    %74 = vector.load %arg8[%c0_34, %c0_35, %c0_36] : memref<2x1x256xf32, #tpu.memory_space<vmem>>, vector<1x1x256xf32>
    %75 = vector.shape_cast %74 : vector<1x1x256xf32> to vector<1x256xf32>
    %76 = vector.broadcast %75 : vector<1x256xf32> to vector<8x256xf32>
    %77 = arith.mulf %73, %76 : vector<8x256xf32>
    %c0_37 = arith.constant 0 : index
    %c0_38 = arith.constant 0 : index
    %c0_39 = arith.constant 0 : index
    %78 = vector.load %arg9[%c0_37, %c0_38, %c0_39] : memref<2x1x256xf32, #tpu.memory_space<vmem>>, vector<1x1x256xf32>
    %79 = vector.shape_cast %78 : vector<1x1x256xf32> to vector<1x256xf32>
    %80 = vector.broadcast %79 : vector<1x256xf32> to vector<8x256xf32>
    %81 = arith.addf %77, %80 : vector<8x256xf32>
    %cst_40 = arith.constant 0.000000e+00 : f32
    %82 = vector.broadcast %cst_40 : f32 to vector<8x256xf32>
    %83 = arith.maximumf %81, %82 : vector<8x256xf32>
    %84 = arith.truncf %83 : vector<8x256xf32> to vector<8x256xbf16>
    %c1 = arith.constant 1 : index
    %c0_41 = arith.constant 0 : index
    %c0_42 = arith.constant 0 : index
    %85 = vector.load %arg7[%c1, %c0_41, %c0_42] : memref<2x256x256xi8, #tpu.memory_space<vmem>>, vector<1x256x256xi8>
    %86 = vector.shape_cast %85 : vector<1x256x256xi8> to vector<256x256xi8>
    %87 = arith.sitofp %86 : vector<256x256xi8> to vector<256x256xbf16>
    %cst_43 = arith.constant dense<0.000000e+00> : vector<8x256xf32>
    %88 = tpu.matmul %84, %87, %cst_43 {dimension_numbers = #tpu.dot_dimension_numbers<[1], [0], [0], [1], [0, 0, 1, 1], [], []>} : vector<8x256xbf16>, vector<256x256xbf16>, vector<8x256xf32> -> vector<8x256xf32>
    %c1_44 = arith.constant 1 : index
    %c0_45 = arith.constant 0 : index
    %c0_46 = arith.constant 0 : index
    %89 = vector.load %arg8[%c1_44, %c0_45, %c0_46] : memref<2x1x256xf32, #tpu.memory_space<vmem>>, vector<1x1x256xf32>
    %90 = vector.shape_cast %89 : vector<1x1x256xf32> to vector<1x256xf32>
    %91 = vector.broadcast %90 : vector<1x256xf32> to vector<8x256xf32>
    %92 = arith.mulf %88, %91 : vector<8x256xf32>
    %c1_47 = arith.constant 1 : index
    %c0_48 = arith.constant 0 : index
    %c0_49 = arith.constant 0 : index
    %93 = vector.load %arg9[%c1_47, %c0_48, %c0_49] : memref<2x1x256xf32, #tpu.memory_space<vmem>>, vector<1x1x256xf32>
    %94 = vector.shape_cast %93 : vector<1x1x256xf32> to vector<1x256xf32>
    %95 = vector.broadcast %94 : vector<1x256xf32> to vector<8x256xf32>
    %96 = arith.addf %92, %95 : vector<8x256xf32>
    %cst_50 = arith.constant 0.000000e+00 : f32
    %97 = vector.broadcast %cst_50 : f32 to vector<8x256xf32>
    %98 = arith.maximumf %96, %97 : vector<8x256xf32>
    %99 = arith.truncf %98 : vector<8x256xf32> to vector<8x256xbf16>
    %c0_51 = arith.constant 0 : index
    %c0_52 = arith.constant 0 : index
    %100 = vector.load %arg10[%c0_51, %c0_52] : memref<256x768xi8, #tpu.memory_space<vmem>>, vector<256x768xi8>
    %101 = arith.sitofp %100 : vector<256x768xi8> to vector<256x768xbf16>
    %cst_53 = arith.constant dense<0.000000e+00> : vector<8x768xf32>
    %102 = tpu.matmul %99, %101, %cst_53 {dimension_numbers = #tpu.dot_dimension_numbers<[1], [0], [0], [1], [0, 0, 1, 1], [], []>} : vector<8x256xbf16>, vector<256x768xbf16>, vector<8x768xf32> -> vector<8x768xf32>
    %c0_54 = arith.constant 0 : index
    %c0_55 = arith.constant 0 : index
    %103 = vector.load %arg11[%c0_54, %c0_55] : memref<1x768xf32, #tpu.memory_space<vmem>>, vector<1x768xf32>
    %104 = vector.broadcast %103 : vector<1x768xf32> to vector<8x768xf32>
    %105 = arith.mulf %102, %104 : vector<8x768xf32>
    %c0_56 = arith.constant 0 : index
    %c0_57 = arith.constant 0 : index
    %106 = vector.load %arg12[%c0_56, %c0_57] : memref<1x768xf32, #tpu.memory_space<vmem>>, vector<1x768xf32>
    %107 = vector.broadcast %106 : vector<1x768xf32> to vector<8x768xf32>
    %108 = arith.addf %105, %107 : vector<8x768xf32>
    %c0_58 = arith.constant 0 : index
    %c0_59 = arith.constant 0 : index
    %109 = vector.load %arg13[%c0_58, %c0_59] : memref<8x768xf32, #tpu.memory_space<vmem>>, vector<8x768xf32>
    tpu.vector_store %arg13[%c0_58, %c0_59], %108 {strides = array<i32>} : memref<8x768xf32, #tpu.memory_space<vmem>>, vector<8x768xf32>,
    return
  }
  func.func @transform_0(%arg0: i32, %arg1: memref<8xi32, #tpu.memory_space<smem>>) -> (i32, i32) {
    %c0_i32 = arith.constant 0 : i32
    %c0_i32_0 = arith.constant 0 : i32
    return %arg0, %c0_i32 : i32, i32
  }
  func.func @transform_1(%arg0: i32, %arg1: memref<8xi32, #tpu.memory_space<smem>>) -> (i32, i32) {
    %c0_i32 = arith.constant 0 : i32
    %c0_i32_0 = arith.constant 0 : i32
    %c0_i32_1 = arith.constant 0 : i32
    return %c0_i32, %c0_i32_0 : i32, i32
  }
  func.func @transform_2(%arg0: i32, %arg1: memref<8xi32, #tpu.memory_space<smem>>) -> (i32, i32) {
    %c0_i32 = arith.constant 0 : i32
    %c0_i32_0 = arith.constant 0 : i32
    %c0_i32_1 = arith.constant 0 : i32
    return %c0_i32, %c0_i32_0 : i32, i32
  }
  func.func @transform_3(%arg0: i32, %arg1: memref<8xi32, #tpu.memory_space<smem>>) -> (i32, i32) {
    %c0_i32 = arith.constant 0 : i32
    %c0_i32_0 = arith.constant 0 : i32
    %c0_i32_1 = arith.constant 0 : i32
    return %c0_i32, %c0_i32_0 : i32, i32
  }
  func.func @transform_4(%arg0: i32, %arg1: memref<8xi32, #tpu.memory_space<smem>>) -> (i32, i32) {
    %c0_i32 = arith.constant 0 : i32
    %c0_i32_0 = arith.constant 0 : i32
    %c0_i32_1 = arith.constant 0 : i32
    return %c0_i32, %c0_i32_0 : i32, i32
  }
  func.func @transform_5(%arg0: i32, %arg1: memref<8xi32, #tpu.memory_space<smem>>) -> (i32, i32, i32) {
    %c0_i32 = arith.constant 0 : i32
    %c0_i32_0 = arith.constant 0 : i32
    %c0_i32_1 = arith.constant 0 : i32
    %c0_i32_2 = arith.constant 0 : i32
    return %c0_i32, %c0_i32_0, %c0_i32_1 : i32, i32, i32
  }
  func.func @transform_6(%arg0: i32, %arg1: memref<8xi32, #tpu.memory_space<smem>>) -> (i32, i32, i32) {
    %c0_i32 = arith.constant 0 : i32
    %c0_i32_0 = arith.constant 0 : i32
    %c0_i32_1 = arith.constant 0 : i32
    %c0_i32_2 = arith.constant 0 : i32
    return %c0_i32, %c0_i32_0, %c0_i32_1 : i32, i32, i32
  }
  func.func @transform_7(%arg0: i32, %arg1: memref<8xi32, #tpu.memory_space<smem>>) -> (i32, i32, i32) {
    %c0_i32 = arith.constant 0 : i32
    %c0_i32_0 = arith.constant 0 : i32
    %c0_i32_1 = arith.constant 0 : i32
    %c0_i32_2 = arith.constant 0 : i32
    return %c0_i32, %c0_i32_0, %c0_i32_1 : i32, i32, i32
  }
  func.func @transform_8(%arg0: i32, %arg1: memref<8xi32, #tpu.memory_space<smem>>) -> (i32, i32) {
    %c0_i32 = arith.constant 0 : i32
    %c0_i32_0 = arith.constant 0 : i32
    %c0_i32_1 = arith.constant 0 : i32
    return %c0_i32, %c0_i32_0 : i32, i32
  }
  func.func @transform_9(%arg0: i32, %arg1: memref<8xi32, #tpu.memory_space<smem>>) -> (i32, i32) {
    %c0_i32 = arith.constant 0 : i32
    %c0_i32_0 = arith.constant 0 : i32
    %c0_i32_1 = arith.constant 0 : i32
    return %c0_i32, %c0_i32_0 : i32, i32
  }
  func.func @transform_10(%arg0: i32, %arg1: memref<8xi32, #tpu.memory_space<smem>>) -> (i32, i32) {
    %c0_i32 = arith.constant 0 : i32
    %c0_i32_0 = arith.constant 0 : i32
    %c0_i32_1 = arith.constant 0 : i32
    return %c0_i32, %c0_i32_0 : i32, i32
  }
  func.func @transform_11(%arg0: i32, %arg1: memref<8xi32, #tpu.memory_space<smem>>) -> (i32, i32) {
    %c0_i32 = arith.constant 0 : i32
    %c0_i32_0 = arith.constant 0 : i32
    return %arg0, %c0_i32 : i32, i32
  }
}

</mosaic_0001>

<bundles_post_ra>
// kernel: diffusion_fc.1
= control target key start
LH: loop header
LB: loop body
LE: loop exit
PB: predicated region body
PF: predicated region fallthrough
CT: control target
= control target key end

     0   :  { %s1789_s0 = inlined_call_operand.vmem [shape: s32[8], index: 0, kind: input, shape index: {}]   ;;  %s1790_s1 = inlined_call_operand.vmem [shape: bf16[8,768], index: 1, kind: input, shape index: {}]   ;;  %s1791_s2 = inlined_call_operand.hbm [shape: f32[100,256], index: 2, kind: input, shape index: {}]   ;;  %s1792_s3 = inlined_call_operand.hbm [shape: s8[768,256], index: 3, kind: input, shape index: {}]   ;;  %s1793_s4 = inlined_call_operand.vmem [shape: f32[1,256], index: 4, kind: input, shape index: {}]   ;;  %s1794_s5 = inlined_call_operand.vmem [shape: f32[1,256], index: 5, kind: input, shape index: {}]   ;;  %s1795_s6 = inlined_call_operand.hbm [shape: s8[2,256,256], index: 6, kind: input, shape index: {}]   ;;  %s1796_s7 = inlined_call_operand.vmem [shape: f32[2,1,256], index: 7, kind: input, shape index: {}]   ;;  %s1797_s8 = inlined_call_operand.vmem [shape: f32[2,1,256], index: 8, kind: input, shape index: {}]   ;;  %s1798_s9 = inlined_call_operand.hbm [shape: s8[256,768], index: 9, kind: input, shape index: {}]   ;;  %s1799_s10 = inlined_call_operand.vmem [shape: f32[1,768], index: 10, kind: input, shape index: {}]   ;;  %s1800_s11 = inlined_call_operand.vmem [shape: f32[1,768], index: 11, kind: input, shape index: {}]   ;;  %s1801_s12 = inlined_call_operand.hbm [shape: f32[8,768], index: 12, kind: output, shape index: {}]  }
   0x1   :  { %s17_s23 = sshll.u32 %s1789_s0, 4  ;;  %s18_s23 = int_to_ptr.vmem [resolvable:$true] %s17_s23 }
   0x2   :  { %s1399_s24 = scalar_lea.vmem %s18_s23, 16  ;;  %p1404_p1 = scmp.lt.s32.totalorder %s18_s23, %s18_s23 }
   0x3   :  { %p1400_p0 = scmp.ne.s32.totalorder %s18_s23, %s1399_s24  ;;  %p1405_p2 = scmp.lt.s32.totalorder %s1399_s24, %s1399_s24 }
   0x5   :  { %p1406_p3 = por %p1405_p2, %p1404_p1 }
   0x7   :  { %p1407_p4 = pnand %p1406_p3, %p1400_p0 }
   0x9   :  { %1410 = shalt.err (!%p1407_p4)  }
   0xa   :  { %s1521_s25 = smov [#allocation3]  }
   0xb   :  { %20 = dma.vmem_to_smem %s18_s23, 16, %s1521_s25, [#allocation2] }
   0xc   :  { %1511 = dma.done.wait [#allocation2], 16 }
   0xd   :  { %1512 = vsyncadd [#allocation2], 4294967280 }
   0xe   :  { %22 = sfence }
   0xf   :  { %23 = vsyncpa [#allocation5], 0 }
  0x10   :  { %24 = vsyncpa [#allocation8], 0 }
  0x11   :  { %25 = vsyncpa [#allocation11], 0 }
  0x12   :  { %26 = vsyncpa [#allocation6], 0  ;;  %s1522_s26 = smov [#allocation7]   ;;  %s1523_s0 = smov [#allocation4]  }
  0x13   :  { %s46_s27 = sshll.u32 %s1522_s26, 4  ;;  %s34_s28 = sshll.u32 %s1523_s0, 4  ;;  %s47_s27 = int_to_ptr.vmem [resolvable:$true] %s46_s27  ;;  %s35_s28 = int_to_ptr.vmem [resolvable:$true] %s34_s28 }
  0x14   :  { %s1419_s29 = scalar_lea.vmem %s47_s27, 6144  ;;  %p1424_p6 = scmp.lt.s32.totalorder %s47_s27, %s47_s27 }
  0x15   :  { %p1420_p5 = scmp.ne.s32.totalorder %s47_s27, %s1419_s29  ;;  %p1425_p7 = scmp.lt.s32.totalorder %s1419_s29, %s1419_s29 }
  0x17   :  { %p1426_p8 = por %p1425_p7, %p1424_p6 }
  0x19   :  { %p1427_p9 = pnand %p1426_p8, %p1420_p5 }
  0x1b   :  { %1430 = shalt.err (!%p1427_p9)
}
  0x1c   :  { %s1524_s30 = smov 256   ;;  %s1525_s13 = smov 16  }
  0x1d   :  { %52 = dma.hbm_to_vmem [thread:$0]  %s1792_s3, 6144, %s47_s27, [#allocation8], %s1524_s30, %s1524_s30, %s1525_s13  }
  0x1e   :  { %s1439_s16 = scalar_lea.vmem %s35_s28, 3328  ;;  %p1444_p11 = scmp.lt.s32.totalorder %s35_s28, %s35_s28 }
  0x1f   :  { %p1440_p10 = scmp.ne.s32.totalorder %s35_s28, %s1439_s16  ;;  %p1445_p12 = scmp.lt.s32.totalorder %s1439_s16, %s1439_s16 }
  0x21   :  { %p1446_p13 = por %p1445_p12, %p1444_p11 }
  0x23   :  { %p1447_p0 = pnand %p1446_p13, %p1440_p10 }
  0x25   :  { %1450 = shalt.err (!%p1447_p0)
}
  0x26   :  { %40 = dma.hbm_to_vmem [thread:$0]  %s1791_s2, 3328, %s35_s28, [#allocation5], %s1524_s30, %s1524_s30, %s1525_s13  }
  0x27   :  { %s1526_s19 = smov [#allocation9]   ;;  %s1527_s21 = smov [#allocation10]  }
  0x28   :  { %s62_s20 = sshll.u32 %s1526_s19, 4  ;;  %s78_s22 = sshll.u32 %s1527_s21, 4  ;;  %s63_s20 = int_to_ptr.vmem [resolvable:$true] %s62_s20  ;;  %s79_s22 = int_to_ptr.vmem [resolvable:$true] %s78_s22 }
  0x29   :  { %s1459_s23 = scalar_lea.vmem %s63_s20, 4096  ;;  %p1464_p2 = scmp.lt.s32.totalorder %s63_s20, %s63_s20 }
  0x2a   :  { %p1460_p1 = scmp.ne.s32.totalorder %s63_s20, %s1459_s23  ;;  %p1465_p3 = scmp.lt.s32.totalorder %s1459_s23, %s1459_s23 }
  0x2c   :  { %p1466_p4 = por %p1465_p3, %p1464_p2 }
  0x2e   :  { %p1467_p5 = pnand %p1466_p4, %p1460_p1 }
  0x30   :  { %1470 = shalt.err (!%p1467_p5)
}
  0x31   :  { %68 = dma.hbm_to_vmem [thread:$0]  %s1795_s6, 4096, %s63_s20, [#allocation8], %s1524_s30, %s1524_s30, %s1525_s13  }
  0x32   :  { %s1479_s25 = scalar_lea.vmem %s79_s22, 6144  ;;  %p1484_p7 = scmp.lt.s32.totalorder %s79_s22, %s79_s22 }
  0x33   :  { %p1480_p6 = scmp.ne.s32.totalorder %s79_s22, %s1479_s25  ;;  %p1485_p8 = scmp.lt.s32.totalorder %s1479_s25, %s1479_s25 }
  0x35   :  { %p1486_p9 = por %p1485_p8, %p1484_p7 }
  0x37   :  { %p1487_p10 = pnand %p1486_p9, %p1480_p6 }
  0x39   :  { %1490 = shalt.err (!%p1487_p10)
}
  0x3a   :  { %s1528_s2 = smov 768   ;;  %s1529_s26 = smov 48  }
  0x3b   :  { %84 = dma.hbm_to_vmem [thread:$0]  %s1798_s9, 6144, %s79_s22, [#allocation11], %s1528_s2, %s1528_s2, %s1529_s26  }
  0x3c   :  { %1513 = dma.done.wait [#allocation5], 3328  }
  0x3d   :  { %1514 = vsyncadd [#allocation5], 4294963968 }
  0x3e   :  { %1515 = dma.done.wait [#allocation8], 10240  }
  0x3f   :  { %1516 = vsyncadd [#allocation8], 4294957056 }
  0x40   :  { %1517 = dma.done.wait [#allocation11], 6144  }
  0x41   :  { %1518 = vsyncadd [#allocation11], 4294961152  ;;  %v112_v0 = vld [vmem:[#allocation7 + $0x38] sm:$0xff]  ;;  %v111_v2 = vld [vmem:[#allocation7 + $0x30] sm:$0xff]  ;;  %s1301_s14 = sld [smem:[#allocation3 + $0x1]]  ;;  %vm628_vm0 = vcmask 1040384  }
  0x42   :  { %v128_v1 = vld [vmem:[#allocation7 + $0xb8] sm:$0xff]  ;;  %v166_v3 = vunpack.c.l.s8.bf16 %v112_v0  ;;  %v168_v4 = vunpack.c.h.s8.bf16 %v112_v0  ;;  %v127_v7 = vld [vmem:[#allocation7 + $0xb0] sm:$0xff]  ;;  %v167_v8 = vunpack.c.h.s8.bf16 %v111_v2  ;;  %v110_v10 = vld [vmem:[#allocation7 + $0x28] sm:$0xff]  ;;  %v165_v12 = vunpack.c.l.s8.bf16 %v111_v2  ;;  %s1309_s15 = sld [smem:[#allocation3 + $0x2]] }
  0x43   :  { %v198_v5 = vunpack.c.l.s8.bf16 %v128_v1  ;;  %v200_v6 = vunpack.c.h.s8.bf16 %v128_v1  ;;  %v199_v9 = vunpack.c.h.s8.bf16 %v127_v7  ;;  %v126_v11 = vld [vmem:[#allocation7 + $0xa8] sm:$0xff]  ;;  %v197_v13 = vunpack.c.l.s8.bf16 %v127_v7  ;;  %v109_v16 = vld [vmem:[#allocation7 + $0x20] sm:$0xff]  ;;  %v108_v22 = vld [vmem:[#allocation7 + $0x18] sm:$0xff]  ;;  %s1317_s17 = sld [smem:[#allocation3 + $0x3]] }
  0x44   :  { %270 = vmatprep.subr.bf16.mxu0 %v168_v4  ;;  %v164_v14 = vunpack.c.h.s8.bf16 %v110_v10  ;;  %v196_v15 = vunpack.c.h.s8.bf16 %v126_v11  ;;  %v125_v17 = vld [vmem:[#allocation7 + $0xa0] sm:$0xff]  ;;  %v163_v18 = vunpack.c.h.s8.bf16 %v109_v16  ;;  %v162_v20 = vunpack.c.l.s8.bf16 %v110_v10  ;;  %v124_v23 = vld [vmem:[#allocation7 + $0x98] sm:$0xff]  ;;  %v107_v28 = vld [vmem:[#allocation7 + $0x10] sm:$0xff]  ;;  %s1655_s18 = sld [smem:[#allocation3 + $0x4]] }
  0x45   :  { %311 = vmatprep.subr.bf16.mxu1 %v200_v6  ;;  %271 = vmatpush1.bf16.msra.mxu0 %v167_v8  ;;  %v195_v19 = vunpack.c.h.s8.bf16 %v125_v17  ;;  %v194_v21 = vunpack.c.l.s8.bf16 %v126_v11  ;;  %v161_v24 = vunpack.c.l.s8.bf16 %v109_v16  ;;  %v193_v25 = vunpack.c.l.s8.bf16 %v125_v17  ;;  %v123_v29 = vld [vmem:[#allocation7 + $0x90] sm:$0xff]  ;;  %v1619_v31 = vld [vmem:[%s1790_s1 + $0x8] sm:$0xff]  ;;  %v106_v37 = vld [vmem:[#allocation7 + $0x8] sm:$0xff]  ;;  %s1657_s20 = sld [smem:[#allocation3 + $0x5]] }
  0x46   :  { %312 = vmatpush1.bf16.msra.mxu1 %v199_v9  ;;  %272 = vmatprep.subr.bf16.mxu0 %v166_v3  ;;  %v160_v26 = vunpack.c.h.s8.bf16 %v108_v22  ;;  %v192_v27 = vunpack.c.h.s8.bf16 %v124_v23  ;;  %v1614_v30 = vld [vmem:[%s1790_s1] sm:$0xff]  ;;  %v159_v32 = vunpack.c.h.s8.bf16 %v107_v28  ;;  %v191_v33 = vunpack.c.h.s8.bf16 %v123_v29  ;;  %v122_v38 = vld [vmem:[#allocation7 + $0x88] sm:$0xff]  ;;  %v105_v44 = vld [vmem:[#allocation7] sm:$0xff]  ;;  %s1659_s25 = sld [smem:[#allocation3 + $0x6]] }
  0x47   :  { %313 = vmatprep.subr.bf16.mxu1 %v198_v5  ;;  %v158_v34 = vunpack.c.l.s8.bf16 %v108_v22  ;;  %v190_v35 = vunpack.c.l.s8.bf16 %v124_v23  ;;  %v1289_v36 = vcombine.high %v1614_v30, %v1614_v30  ;;  %v1291_v39 = vcombine.high %v1619_v31, %v1619_v31  ;;  %v121_v45 = vld [vmem:[#allocation7 + $0x80] sm:$0xff]  ;;  %v120_v50 = vld [vmem:[#allocation7 + $0x78] sm:$0xff]  ;;  %v119_v56 = vld [vmem:[#allocation7 + $0x70] sm:$0xff]  ;;  %p437_p12 = scmp.gt.s32.totalorder %s1301_s14, 0  ;;  %p1302_p0 = scmp.lt.s32.totalorder %s1301_s14, 99 }
  0x48   :  { %v157_v40 = vunpack.c.l.s8.bf16 %v107_v28  ;;  %v189_v41 = vunpack.c.l.s8.bf16 %v123_v29  ;;  %v156_v42 = vunpack.c.h.s8.bf16 %v106_v37  ;;  %v188_v43 = vunpack.c.h.s8.bf16 %v122_v38  ;;  %v136_v51 = vld [vmem:[#allocation7 + $0xf8] sm:$0xff]  ;;  %v135_v57 = vld [vmem:[#allocation7 + $0xf0] sm:$0xff]  ;;  %v118_v62 = vld [vmem:[#allocation7 + $0x68] sm:$0xff]  ;;  %p452_p1 = scmp.gt.s32.totalorder %s1309_s15, 0  ;;  %p1310_p2 = scmp.lt.s32.totalorder %s1309_s15, 99 }
  0x49   :  { %273 = vmatpush1.bf16.msra.mxu0 %v165_v12  ;;  %302 = vmatprep.mubr.bf16.mxu0 %v1289_v36  ;;  %v155_v46 = vunpack.c.h.s8.bf16 %v105_v44  ;;  %v187_v47 = vunpack.c.h.s8.bf16 %v121_v45  ;;  %v154_v48 = vunpack.c.l.s8.bf16 %v106_v37  ;;  %v186_v49 = vunpack.c.l.s8.bf16 %v122_v38  ;;  %v134_v63 = vld [vmem:[#allocation7 + $0xe8] sm:$0xff]  ;;  %v117_v4 = vld [vmem:[#allocation7 + $0x60] sm:$0xff]  ;;  %v116_v10 = vld [vmem:[#allocation7 + $0x58] sm:$0xff]  ;;  %s1803_s14 = smov (!%p437_p12, %s1301_s14), 0  ;;  %p467_p3 = scmp.gt.s32.totalorder %s1317_s17, 0 }
  0x4a   :  { %314 = vmatpush1.bf16.msra.mxu1 %v197_v13  ;;  %274 = vmatprep.subr.bf16.mxu0 %v164_v14  ;;  %v153_v52 = vunpack.c.l.s8.bf16 %v105_v44  ;;  %v185_v53 = vunpack.c.l.s8.bf16 %v121_v45  ;;  %v184_v54 = vunpack.c.h.s8.bf16 %v120_v50  ;;  %v216_v55 = vunpack.c.h.s8.bf16 %v136_v51  ;;  %v133_v5 = vld [vmem:[#allocation7 + $0xe0] sm:$0xff]  ;;  %v132_v11 = vld [vmem:[#allocation7 + $0xd8] sm:$0xff]  ;;  %v115_v16 = vld [vmem:[#allocation7 + $0x50] sm:$0xff]  ;;  %s1807_s14 = smov (!%p1302_p0, %s1803_s14), 99  ;;  %s1809_s15 = smov (!%p452_p1, %s1309_s15), 0 }
  0x4b   :  { %315 = vmatprep.subr.bf16.mxu1 %v196_v15  ;;  %343 = vmatprep.mubr.bf16.mxu1 %v1291_v39  ;;  %v183_v58 = vunpack.c.h.s8.bf16 %v119_v56  ;;  %v215_v59 = vunpack.c.h.s8.bf16 %v135_v57  ;;  %v182_v60 = vunpack.c.l.s8.bf16 %v120_v50  ;;  %v214_v61 = vunpack.c.l.s8.bf16 %v136_v51  ;;  %v131_v17 = vld [vmem:[#allocation7 + $0xd0] sm:$0xff]  ;;  %v114_v22 = vld [vmem:[#allocation7 + $0x48] sm:$0xff]  ;;  %v113_v28 = vld [vmem:[#allocation7 + $0x40] sm:$0xff]  ;;  %s441_s22 = sshra.s32 %s1807_s14, 3  ;;  %s1811_s15 = smov (!%p1310_p2, %s1809_s15), 99 }
  0x4c   :  { %v181_v0 = vunpack.c.l.s8.bf16 %v119_v56  ;;  %v213_v1 = vunpack.c.l.s8.bf16 %v135_v57  ;;  %v180_v2 = vunpack.c.h.s8.bf16 %v118_v62  ;;  %v212_v3 = vunpack.c.h.s8.bf16 %v134_v63  ;;  %v130_v23 = vld [vmem:[#allocation7 + $0xc8] sm:$0xff]  ;;  %v129_v29 = vld [vmem:[#allocation7 + $0xc0] sm:$0xff]  ;;  %v144_v36 = vld [vmem:[#allocation7 + $0x138] sm:$0xff]  ;;  %s444_s3 = sand.u32 7, %s1807_s14  ;;  %s1364_s24 = sshll.u32 %s441_s22, 4 }
  0x4d   :  { %275 = vmatpush1.bf16.msra.mxu0 %v163_v18  ;;  %v179_v6 = vunpack.c.h.s8.bf16 %v117_v4  ;;  %v211_v7 = vunpack.c.h.s8.bf16 %v133_v5  ;;  %v178_v8 = vunpack.c.l.s8.bf16 %v118_v62  ;;  %v210_v9 = vunpack.c.l.s8.bf16 %v134_v63  ;;  %v140_v51 = vld [vmem:[#allocation7 + $0x118] sm:$0xff]  ;;  %v138_v57 = vld [vmem:[#allocation7 + $0x108] sm:$0xff]  ;;  %s456_s26 = sshra.s32 %s1811_s15, 3  ;;  %s1663_s27 = sadd.s32 %s1364_s24, %s444_s3 }
  0x4e   :  { %316 = vmatpush1.bf16.msra.mxu1 %v195_v19  ;;  %276 = vmatprep.subr.bf16.mxu0 %v162_v20  ;;  %v177_v12 = vunpack.c.l.s8.bf16 %v117_v4  ;;  %v209_v13 = vunpack.c.l.s8.bf16 %v133_v5  ;;  %v176_v14 = vunpack.c.h.s8.bf16 %v116_v10  ;;  %v208_v15 = vunpack.c.h.s8.bf16 %v132_v11  ;;  %v152_v63 = vld [vmem:[#allocation7 + $0x178] sm:$0xff]  ;;  %v150_v5 = vld [vmem:[#allocation7 + $0x168] sm:$0xff]  ;;  %p1318_p4 = scmp.lt.s32.totalorder %s1317_s17, 99  ;;  %s1813_s17 = smov (!%p467_p3, %s1317_s17), 0 }
  0x4f   :  { %317 = vmatprep.subr.bf16.mxu1 %v194_v21  ;;  %v175_v18 = vunpack.c.h.s8.bf16 %v115_v16  ;;  %v207_v19 = vunpack.c.h.s8.bf16 %v131_v17  ;;  %v174_v20 = vunpack.c.l.s8.bf16 %v116_v10  ;;  %v206_v21 = vunpack.c.l.s8.bf16 %v132_v11  ;;  %v148_v11 = vld [vmem:[#allocation7 + $0x158] sm:$0xff]  ;;  %s459_s0 = sand.u32 7, %s1811_s15  ;;  %s1367_s6 = sshll.u32 %s456_s26, 4 }
  0x50   :  { %v169_v37 = vunpack.c.l.s8.bf16 %v113_v28  ;;  %v201_v38 = vunpack.c.l.s8.bf16 %v129_v29  ;;  %v232_v39 = vunpack.c.h.s8.bf16 %v144_v36  ;;  %v222_v56 = vunpack.c.l.s8.bf16 %v140_v51  ;;  %p482_p5 = scmp.gt.s32.totalorder %s1655_s18, 0  ;;  %s1666_s9 = sld [smem:[#allocation3 + $0x7]] }
  0x51   :  { %277 = vmatpush1.bf16.msra.mxu0 %v161_v24  ;;  %v173_v24 = vunpack.c.l.s8.bf16 %v115_v16  ;;  %v218_v62 = vunpack.c.l.s8.bf16 %v138_v57  ;;  %v246_v4 = vunpack.c.l.s8.bf16 %v152_v63  ;;  %v242_v10 = vunpack.c.l.s8.bf16 %v150_v5  ;;  %s1668_s28 = sadd.s32 %s1367_s6, %s459_s0  ;;  %p497_p6 = scmp.gt.s32.totalorder %s1657_s20, 0 }
  0x52   :  { %318 = vmatpush1.bf16.msra.mxu1 %v193_v25  ;;  %278 = vmatprep.subr.bf16.mxu0 %v160_v26  ;;  %v205_v25 = vunpack.c.l.s8.bf16 %v131_v17  ;;  %v172_v26 = vunpack.c.h.s8.bf16 %v114_v22  ;;  %v238_v16 = vunpack.c.l.s8.bf16 %v148_v11  ;;  %v146_v17 = vld [vmem:[#allocation7 + $0x148] sm:$0xff]  ;;  %s1815_s17 = smov (!%p1318_p4, %s1813_s17), 99  ;;  %p1326_p7 = scmp.lt.s32.totalorder %s1655_s18, 99  ;;  %vm631_vm1 = vcmask 1041408  }
  0x53   :  { %319 = vmatprep.subr.bf16.mxu1 %v192_v27  ;;  %v204_v27 = vunpack.c.h.s8.bf16 %v130_v23  ;;  %s483_s29 = scalar_select %p482_p5, %s1655_s18, 0  ;;  %vm634_vm2 = vcmask 1042432   ;;  %vm637_vm3 = vcmask 1043456   ;;  %vm640_vm4 = vcmask 1044480  }
  0x54   :  { %p1334_p8 = scmp.lt.s32.totalorder %s1657_s20, 99  ;;  %s1817_s20 = smov (!%p497_p6, %s1657_s20), 0  ;;  %vm643_vm5 = vcmask 1045504   ;;  %vm646_vm6 = vcmask 1046528  }
  0x55   :  { %279 = vmatpush1.bf16.msra.mxu0 %v159_v32  ;;  %v171_v32 = vunpack.c.h.s8.bf16 %v113_v28  ;;  %p512_p9 = scmp.gt.s32.totalorder %s1659_s25, 0  ;;  %s471_s30 = sshra.s32 %s1815_s17, 3 }
  0x56   :  { %320 = vmatpush1.bf16.msra.mxu1 %v191_v33  ;;  %280 = vmatprep.subr.bf16.mxu0 %v158_v34  ;;  %v203_v33 = vunpack.c.h.s8.bf16 %v129_v29  ;;  %v170_v34 = vunpack.c.l.s8.bf16 %v114_v22  ;;  %v234_v22 = vunpack.c.l.s8.bf16 %v146_v17  ;;  %p1342_p10 = scmp.lt.s32.totalorder %s1659_s25, 99  ;;  %s1819_s29 = smov (!%p1326_p7, %s483_s29), 99 }
  0x57   :  { %321 = vmatprep.subr.bf16.mxu1 %v190_v35  ;;  %v202_v35 = vunpack.c.l.s8.bf16 %v130_v23  ;;  %s1821_s20 = smov (!%p1334_p8, %s1817_s20), 99  ;;  %s1823_s25 = smov (!%p512_p9, %s1659_s25), 0 }
  0x58   :  { %s474_s13 = sand.u32 7, %s1815_s17  ;;  %s486_s14 = sshra.s32 %s1819_s29, 3 }
  0x59   :  { %281 = vmatpush1.bf16.msra.mxu0 %v157_v40  ;;  %v143_v40 = vld [vmem:[#allocation7 + $0x130] sm:$0xff]  ;;  %s501_s15 = sshra.s32 %s1821_s20, 3  ;;  %p1350_p12 = scmp.lt.s32.totalorder %s1666_s9, 99 }
  0x5a   :  { %322 = vmatpush1.bf16.msra.mxu1 %v189_v41  ;;  %282 = vmatprep.subr.bf16.mxu0 %v156_v42  ;;  %v1628_v41 = vld [vmem:[%s1790_s1 + $0x10] sm:$0xff]  ;;  %v1288_v42 = vcombine.low %v1614_v30, %v1614_v30  ;;  %v231_v44 = vunpack.c.h.s8.bf16 %v143_v40  ;;  %s1640_s1 = sld [smem:[#allocation3]]  ;;  %s1825_s25 = smov (!%p1342_p10, %s1823_s25), 99 }
  0x5b   :  { %323 = vmatprep.subr.bf16.mxu1 %v188_v43  ;;  %v1290_v43 = vcombine.low %v1619_v31, %v1619_v31  ;;  %v1293_v45 = vcombine.high %v1628_v41, %v1628_v41  ;;  %v141_v30 = vld [vmem:[#allocation7 + $0x120] sm:$0xff]  ;;  %s1373_s22 = sshll.u32 %s486_s14, 4  ;;  %s1376_s3 = sshll.u32 %s501_s15, 4 }
  0x5c   :  { %v227_v50 = vunpack.c.h.s8.bf16 %v141_v30  ;;  %s516_s24 = sshra.s32 %s1825_s25, 3  ;;  %s463_s26 = scalar_lea.vmem [#allocation4], %s1668_s28 }
  0x5d   :  { %283 = vmatpush1.bf16.msra.mxu0 %v155_v46  ;;  %v230_v46 = vunpack.c.l.s8.bf16 %v144_v36  ;;  %s1379_s0 = sshll.u32 %s516_s24, 4 }
  0x5e   :  { %324 = vmatpush1.bf16.msra.mxu1 %v187_v47  ;;  %284 = vmatprep.subr.bf16.mxu0 %v154_v48  ;;  %v142_v47 = vld [vmem:[#allocation7 + $0x128] sm:$0xff]  ;;  %v229_v48 = vunpack.c.l.s8.bf16 %v143_v40 }
  0x5f   :  { %325 = vmatprep.subr.bf16.mxu1 %v186_v49  ;;  %v228_v49 = vunpack.c.h.s8.bf16 %v142_v47  ;;  %v226_v31 = vunpack.c.l.s8.bf16 %v142_v47  ;;  %v653_v47 = vld [vmem:[#allocation9] sm:$0xff] }
  0x60   :  { %p422_p11 = scmp.gt.s32.totalorder %s1640_s1, 0  ;;  %p1294_p13 = scmp.lt.s32.totalorder %s1640_s1, 99 }
  0x61   :  { %285 = vmatpush1.bf16.msra.mxu0 %v153_v52  ;;  %v225_v52 = vunpack.c.l.s8.bf16 %v141_v30  ;;  %v668_v30 = vld [vmem:[#allocation9 + $0x78] sm:$0xff] }
  0x62   :  { %326 = vmatpush1.bf16.msra.mxu1 %v185_v53  ;;  %286 = vmatprep.subr.bf16.mxu0 %v184_v54  ;;  %v224_v53 = vunpack.c.h.s8.bf16 %v140_v51  ;;  %v139_v54 = vld [vmem:[#allocation7 + $0x110] sm:$0xff]  ;;  %s423_s16 = scalar_select %p422_p11, %s1640_s1, 0 }
  0x63   :  { %327 = vmatprep.subr.bf16.mxu1 %v216_v55  ;;  %v223_v55 = vunpack.c.h.s8.bf16 %v139_v54  ;;  %v667_v51 = vld [vmem:[#allocation9 + $0x70] sm:$0xff]  ;;  %p527_p11 = scmp.gt.s32.totalorder %s1666_s9, 0  ;;  %s1370_s1 = sshll.u32 %s471_s30, 4 }
  0x64   :  { %s1805_s16 = smov (!%p1294_p13, %s423_s16), 99  ;;  %s477_s17 = sadd.s32 %s1370_s1, %s474_s13 }
  0x65   :  { %287 = vmatpush2.bf16.msra.mxu0 %v183_v58  ;;  %v221_v58 = vunpack.c.l.s8.bf16 %v139_v54  ;;  %v666_v54 = vld [vmem:[#allocation9 + $0x68] sm:$0xff]  ;;  %s426_s19 = sshra.s32 %s1805_s16, 3  ;;  %s429_s21 = sand.u32 7, %s1805_s16 }
  0x66   :  { %328 = vmatpush2.bf16.msra.mxu1 %v215_v59  ;;  %288 = vmatprep.subr.bf16.mxu0 %v182_v60  ;;  %v220_v59 = vunpack.c.h.s8.bf16 %v138_v57  ;;  %v137_v60 = vld [vmem:[#allocation7 + $0x100] sm:$0xff]  ;;  %s1361_s23 = sshll.u32 %s426_s19, 4  ;;  %s489_s19 = sand.u32 7, %s1819_s29 }
  0x67   :  { %329 = vmatprep.subr.bf16.mxu1 %v214_v61  ;;  %v219_v61 = vunpack.c.h.s8.bf16 %v137_v60  ;;  %v665_v57 = vld [vmem:[#allocation9 + $0x60] sm:$0xff]  ;;  %s1661_s2 = sadd.s32 %s1361_s23, %s429_s21  ;;  %s448_s21 = scalar_lea.vmem [#allocation4], %s1663_s27 }
  0x68   :  { %s528_s16 = scalar_select %p527_p11, %s1666_s9, 0 }
  0x69   :  { %289 = vmatpush2.bf16.msra.mxu0 %v181_v0  ;;  %v217_v0 = vunpack.c.l.s8.bf16 %v137_v60  ;;  %v664_v60 = vld [vmem:[#allocation9 + $0x58] sm:$0xff]  ;;  %s433_s18 = scalar_lea.vmem [#allocation4], %s1661_s2  ;;  %s504_s23 = sand.u32 7, %s1821_s20 }
  0x6a   :  { %330 = vmatpush2.bf16.msra.mxu1 %v213_v1  ;;  %290 = vmatprep.subr.bf16.mxu0 %v180_v2  ;;  %v248_v1 = vunpack.c.h.s8.bf16 %v152_v63  ;;  %v151_v2 = vld [vmem:[#allocation7 + $0x170] sm:$0xff]  ;;  %s1827_s16 = smov (!%p1350_p12, %s528_s16), 99  ;;  %s492_s2 = sadd.s32 %s1373_s22, %s489_s19 }
  0x6b   :  { %331 = vmatprep.subr.bf16.mxu1 %v212_v3  ;;  %v247_v3 = vunpack.c.h.s8.bf16 %v151_v2  ;;  %v663_v63 = vld [vmem:[#allocation9 + $0x50] sm:$0xff]  ;;  %s507_s27 = sadd.s32 %s1376_s3, %s504_s23  ;;  %s519_s20 = sand.u32 7, %s1825_s25 }
  0x6c   :  { %s478_s6 = scalar_lea.vmem [#allocation4], %s477_s17  ;;  %s531_s9 = sshra.s32 %s1827_s16, 3 }
  0x6d   :  { %291 = vmatpush2.bf16.msra.mxu0 %v179_v6  ;;  %v245_v6 = vunpack.c.l.s8.bf16 %v151_v2  ;;  %v689_v2 = vunpack.c.l.s8.bf16 %v663_v63  ;;  %s522_s28 = sadd.s32 %s1379_s0, %s519_s20  ;;  %s493_s29 = scalar_lea.vmem [#allocation4], %s492_s2 }
  0x6e   :  { %332 = vmatpush2.bf16.msra.mxu1 %v211_v7  ;;  %292 = vmatprep.subr.bf16.mxu0 %v178_v8  ;;  %v244_v7 = vunpack.c.h.s8.bf16 %v150_v5  ;;  %v149_v8 = vld [vmem:[#allocation7 + $0x160] sm:$0xff]  ;;  %s534_s30 = sand.u32 7, %s1827_s16  ;;  %s1382_s13 = sshll.u32 %s531_s9, 4 }
  0x6f   :  { %333 = vmatprep.subr.bf16.mxu1 %v210_v9  ;;  %v243_v9 = vunpack.c.h.s8.bf16 %v149_v8  ;;  %v661_v5 = vld [vmem:[#allocation9 + $0x40] sm:$0xff]  ;;  %s508_s25 = scalar_lea.vmem [#allocation4], %s507_s27  ;;  %s537_s1 = sadd.s32 %s1382_s13, %s534_s30 }
  0x70   :  { %s523_s14 = scalar_lea.vmem [#allocation4], %s522_s28  ;;  %s538_s19 = scalar_lea.vmem [#allocation4], %s537_s1 }
  0x71   :  { %293 = vmatpush2.bf16.msra.mxu0 %v177_v12  ;;  %v241_v12 = vunpack.c.l.s8.bf16 %v149_v8  ;;  %v685_v8 = vunpack.c.l.s8.bf16 %v661_v5 }
  0x72   :  { %334 = vmatpush2.bf16.msra.mxu1 %v209_v13  ;;  %294 = vmatprep.subr.bf16.mxu0 %v176_v14  ;;  %v240_v13 = vunpack.c.h.s8.bf16 %v148_v11  ;;  %v147_v14 = vld [vmem:[#allocation7 + $0x150] sm:$0xff] }
  0x73   :  { %335 = vmatprep.subr.bf16.mxu1 %v208_v15  ;;  %v239_v15 = vunpack.c.h.s8.bf16 %v147_v14 }
  0x75   :  { %295 = vmatpush2.bf16.msra.mxu0 %v175_v18  ;;  %v237_v18 = vunpack.c.l.s8.bf16 %v147_v14  ;;  %v780_v14 = vld [vmem:[#allocation9 + $0xa8] sm:$0xff] }
  0x76   :  { %336 = vmatpush2.bf16.msra.mxu1 %v207_v19  ;;  %296 = vmatprep.subr.bf16.mxu0 %v174_v20  ;;  %v236_v19 = vunpack.c.h.s8.bf16 %v146_v17  ;;  %v145_v20 = vld [vmem:[#allocation7 + $0x140] sm:$0xff] }
  0x77   :  { %337 = vmatprep.subr.bf16.mxu1 %v206_v21  ;;  %v235_v21 = vunpack.c.h.s8.bf16 %v145_v20  ;;  %v233_v23 = vunpack.c.l.s8.bf16 %v145_v20  ;;  %v779_v17 = vld [vmem:[#allocation9 + $0xa0] sm:$0xff]  ;;  %v778_v20 = vld [vmem:[#allocation9 + $0x98] sm:$0xff] }
  0x79   :  { %297 = vmatpush2.bf16.msra.mxu0 %v173_v24  ;;  %v1292_v24 = vcombine.low %v1628_v41, %v1628_v41  ;;  %v655_v41 = vld [vmem:[#allocation9 + $0x10] sm:$0xff] }
  0x7a   :  { %338 = vmatpush2.bf16.msra.mxu1 %v205_v25  ;;  %298 = vmatprep.subr.bf16.mxu0 %v172_v26  ;;  %v660_v25 = vld [vmem:[#allocation9 + $0x38] sm:$0xff]  ;;  %v659_v26 = vld [vmem:[#allocation9 + $0x30] sm:$0xff] }
  0x7b   :  { %339 = vmatprep.subr.bf16.mxu1 %v204_v27  ;;  %v684_v27 = vunpack.c.h.s8.bf16 %v660_v25  ;;  %v683_v28 = vunpack.c.h.s8.bf16 %v659_v26  ;;  %v682_v29 = vunpack.c.l.s8.bf16 %v660_v25  ;;  %v796_v25 = vunpack.c.l.s8.bf16 %v778_v20 }
  0x7d   :  { %299 = vmatpush2.bf16.msra.mxu0 %v171_v32  ;;  %v658_v32 = vld [vmem:[#allocation9 + $0x28] sm:$0xff] }
  0x7e   :  { %340 = vmatpush2.bf16.msra.mxu1 %v203_v33  ;;  %300 = vmatprep.subr.bf16.mxu0 %v170_v34  ;;  %v681_v33 = vunpack.c.l.s8.bf16 %v659_v26  ;;  %v680_v34 = vunpack.c.h.s8.bf16 %v658_v32  ;;  %v776_v26 = vld [vmem:[#allocation9 + $0x88] sm:$0xff] }
  0x7f   :  { %341 = vmatprep.subr.bf16.mxu1 %v202_v35  ;;  %v657_v35 = vld [vmem:[#allocation9 + $0x20] sm:$0xff] }
  0x80   :  { %v679_v36 = vunpack.c.h.s8.bf16 %v657_v35 }
  0x81   :  { %301 = vmatpush2.bf16.msra.mxu0 %v169_v37  ;;  %v678_v37 = vunpack.c.l.s8.bf16 %v658_v32 }
  0x82   :  { %342 = vmatpush2.bf16.msra.mxu1 %v201_v38  ;;  %352 = vmatprep.subr.bf16.mxu0 %v232_v39  ;;  %v656_v38 = vld [vmem:[#allocation9 + $0x18] sm:$0xff]  ;;  %v677_v39 = vunpack.c.l.s8.bf16 %v657_v35 }
  0x83   :  { %701 = vmatprep.subr.bf16.mxu1 %v684_v27  ;;  %v676_v40 = vunpack.c.h.s8.bf16 %v656_v38 }
  0x84   :  { %303 = vmatmul.mubr.bf16.vlgmr.msra.gmra.mxu0 %v1288_v42  ;;  %v675_v42 = vunpack.c.h.s8.bf16 %v655_v41 }
  0x85   :  { %344 = vmatmul.mubr.bf16.vlgmr.msra.gmra.mxu1 %v1290_v43  ;;  %353 = vmatpush1.bf16.msra.mxu0 %v231_v44  ;;  %v674_v43 = vunpack.c.l.s8.bf16 %v656_v38  ;;  %v654_v44 = vld [vmem:[#allocation9 + $0x8] sm:$0xff] }
  0x86   :  { %384 = vmatprep.mubr.bf16.mxu0 %v1293_v45  ;;  %354 = vmatprep.subr.bf16.mxu0 %v230_v46  ;;  %v673_v45 = vunpack.c.l.s8.bf16 %v655_v41  ;;  %v672_v46 = vunpack.c.h.s8.bf16 %v654_v44 }
  0x87   :  { %702 = vmatpush1.bf16.msra.mxu1 %v683_v28  ;;  %v794_v28 = vunpack.c.h.s8.bf16 %v776_v26 }
  0x88   :  { %703 = vmatprep.subr.bf16.mxu1 %v682_v29  ;;  %v775_v29 = vld [vmem:[#allocation9 + $0x80] sm:$0xff] }
  0x89   :  { %355 = vmatpush1.bf16.msra.mxu0 %v229_v48  ;;  %v671_v48 = vunpack.c.h.s8.bf16 %v653_v47  ;;  %v793_v32 = vunpack.c.h.s8.bf16 %v775_v29  ;;  %v791_v35 = vunpack.c.l.s8.bf16 %v775_v29 }
  0x8a   :  { %356 = vmatprep.subr.bf16.mxu0 %v228_v49  ;;  %v670_v49 = vunpack.c.l.s8.bf16 %v654_v44 }
  0x8b   :  { %704 = vmatpush1.bf16.msra.mxu1 %v681_v33  ;;  %v792_v33 = vunpack.c.l.s8.bf16 %v776_v26 }
  0x8c   :  { %705 = vmatprep.subr.bf16.mxu1 %v680_v34  ;;  %v790_v34 = vld [vmem:[#allocation9 + $0xf8] sm:$0xff] }
  0x8d   :  { %357 = vmatpush1.bf16.msra.mxu0 %v227_v50  ;;  %v669_v50 = vunpack.c.l.s8.bf16 %v653_v47 }
  0x8e   :  { %358 = vmatprep.subr.bf16.mxu0 %v226_v31  ;;  %v700_v31 = vunpack.c.h.s8.bf16 %v668_v30 }
  0x8f   :  { %706 = vmatpush1.bf16.msra.mxu1 %v679_v36  ;;  %v822_v36 = vunpack.c.h.s8.bf16 %v790_v34 }
  0x90   :  { %707 = vmatprep.subr.bf16.mxu1 %v678_v37  ;;  %v789_v37 = vld [vmem:[#allocation9 + $0xf0] sm:$0xff] }
  0x91   :  { %359 = vmatpush1.bf16.msra.mxu0 %v225_v52  ;;  %v699_v52 = vunpack.c.h.s8.bf16 %v667_v51  ;;  %v821_v38 = vunpack.c.h.s8.bf16 %v789_v37  ;;  %v819_v41 = vunpack.c.l.s8.bf16 %v789_v37 }
  0x92   :  { %360 = vmatprep.subr.bf16.mxu0 %v224_v53  ;;  %v698_v53 = vunpack.c.l.s8.bf16 %v668_v30 }
  0x93   :  { %708 = vmatpush1.bf16.msra.mxu1 %v677_v39  ;;  %v820_v39 = vunpack.c.l.s8.bf16 %v790_v34 }
  0x94   :  { %709 = vmatprep.subr.bf16.mxu1 %v676_v40  ;;  %v788_v40 = vld [vmem:[#allocation9 + $0xe8] sm:$0xff] }
  0x95   :  { %361 = vmatpush1.bf16.msra.mxu0 %v223_v55  ;;  %v697_v55 = vunpack.c.l.s8.bf16 %v667_v51 }
  0x96   :  { %362 = vmatprep.subr.bf16.mxu0 %v222_v56  ;;  %v696_v56 = vunpack.c.h.s8.bf16 %v666_v54 }
  0x97   :  { %710 = vmatpush1.bf16.msra.mxu1 %v675_v42  ;;  %v818_v42 = vunpack.c.h.s8.bf16 %v788_v40 }
  0x98   :  { %711 = vmatprep.subr.bf16.mxu1 %v674_v43  ;;  %v787_v43 = vld [vmem:[#allocation9 + $0xe0] sm:$0xff] }
  0x99   :  { %363 = vmatpush1.bf16.msra.mxu0 %v221_v58  ;;  %v695_v58 = vunpack.c.h.s8.bf16 %v665_v57  ;;  %v817_v44 = vunpack.c.h.s8.bf16 %v787_v43  ;;  %v815_v47 = vunpack.c.l.s8.bf16 %v787_v43 }
  0x9a   :  { %364 = vmatprep.subr.bf16.mxu0 %v220_v59  ;;  %v694_v59 = vunpack.c.l.s8.bf16 %v666_v54 }
  0x9b   :  { %712 = vmatpush1.bf16.msra.mxu1 %v673_v45  ;;  %v816_v45 = vunpack.c.l.s8.bf16 %v788_v40 }
  0x9c   :  { %713 = vmatprep.subr.bf16.mxu1 %v672_v46  ;;  %v1638_v46 = vld [vmem:[#allocation9 + $0xd8] sm:$0xff] }
  0x9d   :  { %365 = vmatpush1.bf16.msra.mxu0 %v219_v61  ;;  %v693_v61 = vunpack.c.l.s8.bf16 %v665_v57 }
  0x9e   :  { %366 = vmatprep.subr.bf16.mxu0 %v218_v62  ;;  %v692_v62 = vunpack.c.h.s8.bf16 %v664_v60 }
  0x9f   :  { %714 = vmatpush1.bf16.msra.mxu1 %v671_v48  ;;  %v814_v48 = vunpack.c.h.s8.bf16 %v1638_v46 }
  0xa0   :  { %715 = vmatprep.subr.bf16.mxu1 %v670_v49  ;;  %v1643_v49 = vld [vmem:[#allocation9 + $0xd0] sm:$0xff] }
  0xa1   :  { %367 = vmatpush1.bf16.msra.mxu0 %v217_v0  ;;  %v691_v0 = vunpack.c.h.s8.bf16 %v663_v63  ;;  %v813_v30 = vunpack.c.h.s8.bf16 %v1643_v49 }
  0xa2   :  { %368 = vmatprep.subr.bf16.mxu0 %v248_v1  ;;  %v690_v1 = vunpack.c.l.s8.bf16 %v664_v60 }
  0xa3   :  { %716 = vmatpush1.bf16.msra.mxu1 %v669_v50 }
  0xa4   :  { %717 = vmatprep.subr.bf16.mxu1 %v700_v31 }
  0xa5   :  { %369 = vmatpush2.bf16.msra.mxu0 %v247_v3  ;;  %v662_v3 = vld [vmem:[#allocation9 + $0x48] sm:$0xff] }
  0xa6   :  { %370 = vmatprep.subr.bf16.mxu0 %v246_v4  ;;  %v688_v4 = vunpack.c.h.s8.bf16 %v662_v3 }
  0xa7   :  { %718 = vmatpush2.bf16.msra.mxu1 %v699_v52 }
  0xa8   :  { %719 = vmatprep.subr.bf16.mxu1 %v698_v53 }
  0xa9   :  { %371 = vmatpush2.bf16.msra.mxu0 %v245_v6  ;;  %v687_v6 = vunpack.c.h.s8.bf16 %v661_v5  ;;  %v479_v5 = vld [vmem:[%s478_s6] ss:$8 sm:$0x3] }
  0xaa   :  { %372 = vmatprep.subr.bf16.mxu0 %v244_v7  ;;  %v686_v7 = vunpack.c.l.s8.bf16 %v662_v3 }
  0xab   :  { %720 = vmatpush2.bf16.msra.mxu1 %v697_v55 }
  0xac   :  { %721 = vmatprep.subr.bf16.mxu1 %v696_v56 }
  0xad   :  { %373 = vmatpush2.bf16.msra.mxu0 %v243_v9  ;;  %v782_v9 = vld [vmem:[#allocation9 + $0xb8] sm:$0xff] }
  0xae   :  { %374 = vmatprep.subr.bf16.mxu0 %v242_v10  ;;  %v781_v10 = vld [vmem:[#allocation9 + $0xb0] sm:$0xff]  ;;  %v806_v11 = vunpack.c.h.s8.bf16 %v782_v9 }
  0xaf   :  { %722 = vmatpush2.bf16.msra.mxu1 %v695_v58  ;;  %v395_v58 = vlaneseq }
  0xb0   :  { %723 = vmatprep.subr.bf16.mxu1 %v694_v59 }
  0xb1   :  { %375 = vmatpush2.bf16.msra.mxu0 %v241_v12  ;;  %v805_v12 = vunpack.c.h.s8.bf16 %v781_v10  ;;  %v1681_v59 = vshrl.u32 %v395_v58, 7 }
  0xb2   :  { %376 = vmatprep.subr.bf16.mxu0 %v240_v13  ;;  %v804_v13 = vunpack.c.l.s8.bf16 %v782_v9 }
  0xb3   :  { %724 = vmatpush2.bf16.msra.mxu1 %v693_v61  ;;  %v1689_v60 = vsub.s32 0, %v1681_v59  ;;  %v434_v61 = vld [vmem:[%s433_s18] ss:$8 sm:$0x3]  ;;  %v1695_v63 = vsub.s32 1, %v1681_v59 }
  0xb4   :  { %725 = vmatprep.subr.bf16.mxu1 %v692_v62  ;;  %v449_v62 = vld [vmem:[%s448_s21] ss:$8 sm:$0x3] }
  0xb5   :  { %377 = vmatpush2.bf16.msra.mxu0 %v239_v15  ;;  %v803_v15 = vunpack.c.l.s8.bf16 %v781_v10  ;;  %v548_v3 = vrot.slane %v434_v61, %v1695_v63  ;;  %v494_v10 = vld [vmem:[%s493_s29] ss:$8 sm:$0x3] }
  0xb6   :  { %378 = vmatprep.subr.bf16.mxu0 %v238_v16  ;;  %v802_v16 = vunpack.c.h.s8.bf16 %v780_v14 }
  0xb7   :  { %726 = vmatpush2.bf16.msra.mxu1 %v691_v0  ;;  %v464_v0 = vld [vmem:[%s463_s26] ss:$8 sm:$0x3] }
  0xb8   :  { %727 = vmatprep.subr.bf16.mxu1 %v690_v1  ;;  %v544_v1 = vrot.slane %v434_v61, %v1689_v60  ;;  %v812_v61 = vunpack.c.l.s8.bf16 %v1638_v46 }
  0xb9   :  { %379 = vmatpush2.bf16.msra.mxu0 %v237_v18  ;;  %v801_v18 = vunpack.c.h.s8.bf16 %v779_v17 }
  0xba   :  { %380 = vmatprep.subr.bf16.mxu0 %v236_v19  ;;  %v800_v19 = vunpack.c.l.s8.bf16 %v780_v14 }
  0xbb   :  { %728 = vmatpush2.bf16.msra.mxu1 %v689_v2  ;;  %v555_v2 = vrot.slane %v449_v62, %v1689_v60 }
  0xbc   :  { %729 = vmatprep.subr.bf16.mxu1 %v688_v4  ;;  %v559_v4 = vrot.slane %v449_v62, %v1695_v63  ;;  %v811_v62 = vunpack.c.l.s8.bf16 %v1643_v49 }
  0xbd   :  { %381 = vmatpush2.bf16.msra.mxu0 %v235_v21  ;;  %v799_v21 = vunpack.c.l.s8.bf16 %v779_v17 }
  0xbe   :  { %382 = vmatprep.subr.bf16.mxu0 %v234_v22  ;;  %v798_v22 = vunpack.c.h.s8.bf16 %v778_v20  ;;  %v630_v9 = vsel %vm628_vm0, %v548_v3, %v559_v4  ;;  %v524_v20 = vld [vmem:[%s523_s14] ss:$8 sm:$0x3] }
  0xbf   :  { %730 = vmatpush2.bf16.msra.mxu1 %v687_v6  ;;  %v566_v6 = vrot.slane %v464_v0, %v1689_v60 }
  0xc0   :  { %731 = vmatprep.subr.bf16.mxu1 %v686_v7  ;;  %v629_v7 = vsel %vm628_vm0, %v544_v1, %v555_v2  ;;  %v783_v2 = vld [vmem:[#allocation9 + $0xc0] sm:$0xff] }
  0xc1   :  { %383 = vmatpush2.bf16.msra.mxu0 %v233_v23  ;;  %v777_v23 = vld [vmem:[#allocation9 + $0x90] sm:$0xff]  ;;  %v809_v3 = vunpack.c.h.s8.bf16 %v783_v2 }
  0xc2   :  { %823 = vmatprep.subr.bf16.mxu0 %v806_v11  ;;  %v795_v27 = vunpack.c.l.s8.bf16 %v777_v23  ;;  %v577_v11 = vrot.slane %v479_v5, %v1689_v60 }
  0xc3   :  { %732 = vmatpush2.bf16.msra.mxu1 %v685_v8  ;;  %v570_v8 = vrot.slane %v464_v0, %v1695_v63  ;;  %v784_v0 = vld [vmem:[#allocation9 + $0xc8] sm:$0xff] }
  0xc4   :  { %385 = vmatmul.mubr.bf16.vlgmr.msra.gmra.mxu0 %v1292_v24  ;;  %v797_v24 = vunpack.c.h.s8.bf16 %v777_v23  ;;  %v810_v1 = vunpack.c.h.s8.bf16 %v784_v0  ;;  %v808_v4 = vunpack.c.l.s8.bf16 %v784_v0 }
  0xc5   :  { %824 = vmatpush1.bf16.msra.mxu0 %v805_v12  ;;  %v632_v12 = vsel %vm631_vm1, %v629_v7, %v566_v6  ;;  %v633_v14 = vsel %vm631_vm1, %v630_v9, %v570_v8  ;;  %v917_v6 = vld [vmem:[#allocation10 + $0x98] sm:$0xff]  ;;  %v916_v7 = vld [vmem:[#allocation10 + $0x90] sm:$0xff]  ;;  %v1739_v8 = vld [vmem:[#allocation10 + $0xa8] sm:$0xff] }
  0xc6   :  { %825 = vmatprep.subr.bf16.mxu0 %v804_v13  ;;  %v581_v13 = vrot.slane %v479_v5, %v1695_v63  ;;  %v635_v17 = vsel %vm634_vm2, %v632_v12, %v577_v11  ;;  %v807_v5 = vunpack.c.l.s8.bf16 %v783_v2  ;;  %v989_v9 = vunpack.c.h.s8.bf16 %v917_v6  ;;  %v911_v12 = vld [vmem:[#allocation10 + $0x68] sm:$0xff] }
  0xc7   :  { %v988_v46 = vunpack.c.h.s8.bf16 %v916_v7  ;;  %v991_v49 = vunpack.c.h.s8.bf16 %v1739_v8  ;;  %v982_v11 = vunpack.c.l.s8.bf16 %v916_v7 }
  0xc8   :  { %1042 = vmatprep.subr.bf16.mxu1 %v989_v9  ;;  %v985_v9 = vunpack.c.l.s8.bf16 %v1739_v8 }
  0xc9   :  { %826 = vmatpush1.bf16.msra.mxu0 %v803_v15  ;;  %v509_v15 = vld [vmem:[%s508_s25] ss:$8 sm:$0x3] }
  0xca   :  { %827 = vmatprep.subr.bf16.mxu0 %v802_v16  ;;  %v588_v16 = vrot.slane %v494_v10, %v1689_v60 }
  0xcc   :  { %v638_v23 = vsel %vm637_vm3, %v635_v17, %v588_v16  ;;  %v971_v16 = vunpack.c.l.s8.bf16 %v911_v12 }
  0xcd   :  { %828 = vmatpush1.bf16.msra.mxu0 %v801_v18  ;;  %v592_v18 = vrot.slane %v494_v10, %v1695_v63  ;;  %v983_v10 = vunpack.c.l.s8.bf16 %v917_v6 }
  0xce   :  { %829 = vmatprep.subr.bf16.mxu0 %v800_v19  ;;  %v636_v19 = vsel %vm634_vm2, %v633_v14, %v581_v13  ;;  %v910_v13 = vld [vmem:[#allocation10 + $0x60] sm:$0xff]  ;;  %v977_v14 = vunpack.c.h.s8.bf16 %v911_v12 }
  0xcf   :  { %v639_v26 = vsel %vm637_vm3, %v636_v19, %v592_v18  ;;  %v970_v17 = vunpack.c.l.s8.bf16 %v910_v13  ;;  %v905_v18 = vld [vmem:[#allocation10 + $0x38] sm:$0xff]  ;;  %v904_v19 = vld [vmem:[#allocation10 + $0x30] sm:$0xff] }
  0xd1   :  { %830 = vmatpush1.bf16.msra.mxu0 %v799_v21  ;;  %v599_v21 = vrot.slane %v509_v15, %v1689_v60 }
  0xd2   :  { %831 = vmatprep.subr.bf16.mxu0 %v798_v22  ;;  %v393_v22 = vld [vmem:[%s1793_s4] sm:$0x3] }
  0xd3   :  { %v398_v29 = vrot.slane %v393_v22, %v1689_v60  ;;  %v402_v40 = vrot.slane %v393_v22, %v1695_v63  ;;  %v959_v22 = vunpack.c.l.s8.bf16 %v905_v18 }
  0xd5   :  { %832 = vmatpush1.bf16.msra.mxu0 %v797_v24  ;;  %v603_v24 = vrot.slane %v509_v15, %v1695_v63  ;;  %v976_v15 = vunpack.c.h.s8.bf16 %v910_v13 }
  0xd6   :  { %833 = vmatprep.subr.bf16.mxu0 %v796_v25  ;;  %v407_v25 = vld [vmem:[%s1794_s5] sm:$0x3] }
  0xd9   :  { %834 = vmatpush1.bf16.msra.mxu0 %v795_v27  ;;  %v539_v27 = vld [vmem:[%s538_s19] ss:$8 sm:$0x3] }
  0xda   :  { %835 = vmatprep.subr.bf16.mxu0 %v794_v28  ;;  %v610_v28 = vrot.slane %v524_v20, %v1689_v60  ;;  %v625_v43 = vrot.slane %v539_v27, %v1695_v63 }
  0xdd   :  { %836 = vmatpush1.bf16.msra.mxu0 %v793_v32  ;;  %v641_v32 = vsel %vm640_vm4, %v638_v23, %v599_v21  ;;  %v964_v21 = vunpack.c.h.s8.bf16 %v904_v19  ;;  %v958_v23 = vunpack.c.l.s8.bf16 %v904_v19  ;;  %v901_v19 = vld [vmem:[#allocation10 + $0x18] sm:$0xff] }
  0xde   :  { %837 = vmatprep.subr.bf16.mxu0 %v792_v33  ;;  %v614_v33 = vrot.slane %v524_v20, %v1695_v63  ;;  %v965_v20 = vunpack.c.h.s8.bf16 %v905_v18 }
  0xe1   :  { %838 = vmatpush1.bf16.msra.mxu0 %v791_v35  ;;  %v412_v35 = vrot.slane %v407_v25, %v1689_v60 }
  0xe2   :  { %839 = vmatprep.subr.bf16.mxu0 %v822_v36  ;;  %v642_v36 = vsel %vm640_vm4, %v639_v26, %v603_v24  ;;  %v899_v24 = vld [vmem:[#allocation10 + $0x8] sm:$0xff] }
  0xe3   :  { %v953_v26 = vunpack.c.h.s8.bf16 %v899_v24 }
  0xe5   :  { %840 = vmatpush2.bf16.msra.mxu0 %v821_v38 }
  0xe6   :  { %841 = vmatprep.subr.bf16.mxu0 %v820_v39  ;;  %v621_v39 = vrot.slane %v539_v27, %v1689_v60 }
  0xe9   :  { %842 = vmatpush2.bf16.msra.mxu0 %v819_v41  ;;  %v644_v41 = vsel %vm643_vm5, %v641_v32, %v610_v28  ;;  %v947_v28 = vunpack.c.l.s8.bf16 %v899_v24  ;;  %v941_v32 = vld [vmem:[#allocation10 + $0x158] sm:$0xff]  ;;  %v949_v24 = vunpack.c.l.s8.bf16 %v901_v19 }
  0xea   :  { %843 = vmatprep.subr.bf16.mxu0 %v818_v42 }
  0xed   :  { %844 = vmatpush2.bf16.msra.mxu0 %v817_v44 }
  0xee   :  { %845 = vmatprep.subr.bf16.mxu0 %v816_v45 }
  0xf1   :  { %846 = vmatpush2.bf16.msra.mxu0 %v815_v47  ;;  %v416_v47 = vrot.slane %v407_v25, %v1695_v63  ;;  %v898_v25 = vld [vmem:[#allocation10] sm:$0xff] }
  0xf2   :  { %847 = vmatprep.subr.bf16.mxu0 %v814_v48  ;;  %v645_v48 = vsel %vm643_vm5, %v642_v36, %v614_v33  ;;  %v952_v27 = vunpack.c.h.s8.bf16 %v898_v25  ;;  %v940_v33 = vld [vmem:[#allocation10 + $0x150] sm:$0xff]  ;;  %v1031_v36 = vunpack.c.l.s8.bf16 %v941_v32 }
  0xf5   :  { %848 = vmatpush2.bf16.msra.mxu0 %v813_v30 }
  0xf6   :  { %849 = vmatprep.subr.bf16.mxu0 %v812_v61 }
  0xf9   :  { %850 = vmatpush2.bf16.msra.mxu0 %v811_v62 }
  0xfa   :  { %851 = vmatprep.subr.bf16.mxu0 %v810_v1 }
  0xfd   :  { %852 = vmatpush2.bf16.msra.mxu0 %v809_v3  ;;  %v918_v3 = vld [vmem:[#allocation10 + $0xa0] sm:$0xff] }
  0xfe   :  { %853 = vmatprep.subr.bf16.mxu0 %v808_v4  ;;  %v990_v6 = vunpack.c.h.s8.bf16 %v918_v3 }
 0x101   :  { %854 = vmatpush2.bf16.msra.mxu0 %v807_v5 }
 0x102   :  { %1083 = vmatprep.subr.bf16.mxu0 %v991_v49  ;;  %v984_v49 = vunpack.c.l.s8.bf16 %v918_v3 }
 0x144   :  { %v304_v50 = vpop.f32.mrf.mxu0 }
 0x145   :  { %v345_v31 = vpop.f32.mrf.mxu1 }
 0x146   :  { %v1646_v51 = vadd.f32 %v345_v31, %v304_v50  ;;  %v1648_v52 = vpop.f32.mrf.mxu0  ;;  %v647_v31 = vsel %vm646_vm6, %v644_v41, %v621_v39  ;;  %v934_v39 = vld [vmem:[#allocation10 + $0x120] sm:$0xff] }
 0x147   :  { %v1650_v53 = vpop.f32.mrf.mxu1  ;;  %v1024_v41 = vunpack.c.h.s8.bf16 %v934_v39 }
 0x148   :  { %v308_v54 = vpop.f32.mrf.mxu0  ;;  %v348_v37 = vadd.f32 %v1650_v53, %v1648_v52  ;;  %v648_v53 = vsel %vm646_vm6, %v645_v48, %v625_v43  ;;  %v1018_v43 = vunpack.c.l.s8.bf16 %v934_v39  ;;  %v931_v39 = vld [vmem:[#allocation10 + $0x108] sm:$0xff] }
 0x149   :  { %v349_v55 = vpop.f32.mrf.mxu1 }
 0x14a   :  { %v309_v56 = vpop.f32.mrf.mxu0 }
 0x14b   :  { %v350_v57 = vpop.f32.mrf.mxu1 }
 0x184   :  { %v386_v34 = vpop.f32.mrf.mxu0 }
 0x185   :  { %v387_v38 = vadd.f32 %v386_v34, %v1646_v51  ;;  %v1037_v34 = vunpack.c.h.s8.bf16 %v941_v32 }
 0x186   :  { %v388_v42 = vpop.f32.mrf.mxu0 }
 0x187   :  { %v405_v44 = vmul.f32 %v398_v29, %v387_v38  ;;  %v389_v45 = vadd.f32 %v388_v42, %v348_v37  ;;  %v946_v29 = vunpack.c.l.s8.bf16 %v898_v25  ;;  %v1030_v37 = vunpack.c.l.s8.bf16 %v940_v33  ;;  %v935_v38 = vld [vmem:[#allocation10 + $0x128] sm:$0xff] }
 0x188   :  { %v390_v30 = vpop.f32.mrf.mxu0  ;;  %v1019_v42 = vunpack.c.l.s8.bf16 %v935_v38  ;;  %v943_v25 = vld [vmem:[#allocation10 + $0x168] sm:$0xff] }
 0x189   :  { %v419_v50 = vadd.f32 %v412_v35, %v405_v44  ;;  %v406_v51 = vmul.f32 %v402_v40, %v389_v45  ;;  %v1036_v35 = vunpack.c.h.s8.bf16 %v940_v33  ;;  %v1025_v40 = vunpack.c.h.s8.bf16 %v935_v38  ;;  %v929_v44 = vld [vmem:[#allocation10 + $0xf8] sm:$0xff]  ;;  %v1742_v45 = vld [vmem:[#allocation10 + $0xf0] sm:$0xff] }
 0x18a   :  { %v391_v52 = vpop.f32.mrf.mxu0  ;;  %v1012_v48 = vunpack.c.h.s8.bf16 %v1742_v45  ;;  %v1007_v30 = vunpack.c.l.s8.bf16 %v929_v44  ;;  %v1033_v32 = vunpack.c.l.s8.bf16 %v943_v25  ;;  %v937_v33 = vld [vmem:[#allocation10 + $0x138] sm:$0xff] }
 0x18b   :  { %v420_v54 = vadd.f32 %v416_v47, %v406_v51  ;;  %v649_v55 = vadd.f32 %v647_v31, %v419_v50  ;;  %v1013_v47 = vunpack.c.h.s8.bf16 %v929_v44  ;;  %v742_v50 = vld [vmem:[%s1796_s7] sm:$0x3]  ;;  %v1021_v38 = vunpack.c.l.s8.bf16 %v937_v33 }
 0x18c   :  { %v756_v31 = vld [vmem:[%s1797_s8] sm:$0x3]  ;;  %v747_v51 = vrot.slane %v742_v50, %v1689_v60  ;;  %v1006_v44 = vunpack.c.l.s8.bf16 %v1742_v45 }
 0x18d   :  { %v650_v56 = vadd.f32 %v648_v53, %v420_v54  ;;  %v651_v58 = vpack.c.bf16 %v649_v55, %v649_v55  ;;  %v761_v52 = vrot.slane %v756_v31, %v1689_v60  ;;  %v751_v53 = vrot.slane %v742_v50, %v1695_v63 }
 0x18f   :  { %v652_v57 = vpack.c.bf16 %v650_v56, %v650_v56  ;;  %v765_v56 = vrot.slane %v756_v31, %v1695_v63  ;;  %v922_v31 = vld [vmem:[#allocation10 + $0xc0] sm:$0xff] }
 0x191   :  { %733 = vmatprep.mubr.bf16.mxu1 %v652_v57 }
 0x192   :  { %734 = vmatmul.mubr.bf16.vlgmr.msra.gmra.mxu1 %v651_v58 }
 0x193   :  { %1043 = vmatpush1.bf16.msra.mxu1 %v988_v46  ;;  %v913_v46 = vld [vmem:[#allocation10 + $0x78] sm:$0xff] }
 0x194   :  { %1044 = vmatprep.subr.bf16.mxu1 %v983_v10  ;;  %v979_v10 = vunpack.c.h.s8.bf16 %v913_v46  ;;  %v973_v13 = vunpack.c.l.s8.bf16 %v913_v46 }
 0x197   :  { %1045 = vmatpush1.bf16.msra.mxu1 %v982_v11  ;;  %v912_v11 = vld [vmem:[#allocation10 + $0x70] sm:$0xff] }
 0x198   :  { %1046 = vmatprep.subr.bf16.mxu1 %v977_v14  ;;  %v978_v12 = vunpack.c.h.s8.bf16 %v912_v11  ;;  %v907_v14 = vld [vmem:[#allocation10 + $0x48] sm:$0xff] }
 0x199   :  { %v961_v18 = vunpack.c.l.s8.bf16 %v907_v14 }
 0x19b   :  { %1047 = vmatpush1.bf16.msra.mxu1 %v976_v15  ;;  %v972_v15 = vunpack.c.l.s8.bf16 %v912_v11 }
 0x19c   :  { %1048 = vmatprep.subr.bf16.mxu1 %v971_v16  ;;  %v967_v16 = vunpack.c.h.s8.bf16 %v907_v14  ;;  %v920_v14 = vld [vmem:[#allocation10 + $0xb0] sm:$0xff] }
 0x19f   :  { %1049 = vmatpush1.bf16.msra.mxu1 %v970_v17  ;;  %v906_v17 = vld [vmem:[#allocation10 + $0x40] sm:$0xff] }
 0x1a0   :  { %1050 = vmatprep.subr.bf16.mxu1 %v965_v20  ;;  %v966_v8 = vunpack.c.h.s8.bf16 %v906_v17  ;;  %v960_v20 = vunpack.c.l.s8.bf16 %v906_v17  ;;  %v992_v17 = vunpack.c.h.s8.bf16 %v920_v14 }
 0x1a3   :  { %1051 = vmatpush1.bf16.msra.mxu1 %v964_v21  ;;  %v955_v21 = vunpack.c.h.s8.bf16 %v901_v19  ;;  %v915_v19 = vld [vmem:[#allocation10 + $0x88] sm:$0xff] }
 0x1a4   :  { %1052 = vmatprep.subr.bf16.mxu1 %v959_v22  ;;  %v900_v22 = vld [vmem:[#allocation10 + $0x10] sm:$0xff] }
 0x1a7   :  { %1053 = vmatpush1.bf16.msra.mxu1 %v958_v23  ;;  %v954_v23 = vunpack.c.h.s8.bf16 %v900_v22 }
 0x1a8   :  { %1054 = vmatprep.subr.bf16.mxu1 %v953_v26  ;;  %v948_v26 = vunpack.c.l.s8.bf16 %v900_v22  ;;  %v914_v22 = vld [vmem:[#allocation10 + $0x80] sm:$0xff] }
 0x1ab   :  { %1055 = vmatpush1.bf16.msra.mxu1 %v952_v27  ;;  %v1039_v27 = vunpack.c.h.s8.bf16 %v943_v25  ;;  %v909_v25 = vld [vmem:[#allocation10 + $0x58] sm:$0xff] }
 0x1ac   :  { %1056 = vmatprep.subr.bf16.mxu1 %v947_v28  ;;  %v942_v28 = vld [vmem:[#allocation10 + $0x160] sm:$0xff] }
 0x1af   :  { %1057 = vmatpush1.bf16.msra.mxu1 %v946_v29  ;;  %v1038_v29 = vunpack.c.h.s8.bf16 %v942_v28 }
 0x1b0   :  { %1058 = vmatprep.subr.bf16.mxu1 %v1037_v34  ;;  %v1032_v34 = vunpack.c.l.s8.bf16 %v942_v28  ;;  %v908_v28 = vld [vmem:[#allocation10 + $0x50] sm:$0xff] }
 0x1b3   :  { %1059 = vmatpush2.bf16.msra.mxu1 %v1036_v35  ;;  %v1027_v35 = vunpack.c.h.s8.bf16 %v937_v33  ;;  %v903_v33 = vld [vmem:[#allocation10 + $0x28] sm:$0xff] }
 0x1b4   :  { %1060 = vmatprep.subr.bf16.mxu1 %v1031_v36  ;;  %v936_v36 = vld [vmem:[#allocation10 + $0x130] sm:$0xff] }
 0x1b7   :  { %1061 = vmatpush2.bf16.msra.mxu1 %v1030_v37  ;;  %v1026_v37 = vunpack.c.h.s8.bf16 %v936_v36 }
 0x1b8   :  { %1062 = vmatprep.subr.bf16.mxu1 %v1025_v40  ;;  %v1020_v40 = vunpack.c.l.s8.bf16 %v936_v36  ;;  %v902_v36 = vld [vmem:[#allocation10 + $0x20] sm:$0xff] }
 0x1bb   :  { %1063 = vmatpush2.bf16.msra.mxu1 %v1024_v41  ;;  %v1015_v41 = vunpack.c.h.s8.bf16 %v931_v39 }
 0x1bc   :  { %1064 = vmatprep.subr.bf16.mxu1 %v1019_v42  ;;  %v930_v42 = vld [vmem:[#allocation10 + $0x100] sm:$0xff] }
 0x1bf   :  { %1065 = vmatpush2.bf16.msra.mxu1 %v1018_v43  ;;  %v1014_v43 = vunpack.c.h.s8.bf16 %v930_v42 }
 0x1c0   :  { %1066 = vmatprep.subr.bf16.mxu1 %v1013_v47  ;;  %v1009_v47 = vunpack.c.l.s8.bf16 %v931_v39  ;;  %v945_v39 = vld [vmem:[#allocation10 + $0x178] sm:$0xff] }
 0x1c3   :  { %1067 = vmatpush2.bf16.msra.mxu1 %v1012_v48  ;;  %v1008_v48 = vunpack.c.l.s8.bf16 %v930_v42  ;;  %v944_v42 = vld [vmem:[#allocation10 + $0x170] sm:$0xff] }
 0x1c4   :  { %1068 = vmatprep.subr.bf16.mxu1 %v1007_v30  ;;  %v923_v30 = vld [vmem:[#allocation10 + $0xc8] sm:$0xff] }
 0x1c5   :  { %v1001_v50 = vunpack.c.h.s8.bf16 %v923_v30 }
 0x1c7   :  { %1069 = vmatpush2.bf16.msra.mxu1 %v1006_v44  ;;  %v1035_v44 = vunpack.c.l.s8.bf16 %v945_v39 }
 0x1c8   :  { %1070 = vmatprep.subr.bf16.mxu1 %v1001_v50  ;;  %v938_v50 = vld [vmem:[#allocation10 + $0x140] sm:$0xff] }
 0x252   :  { %v735_v54 = vpop.f32.mrf.mxu1 }
 0x253   :  { %v754_v55 = vmul.f32 %v747_v51, %v735_v54  ;;  %v925_v51 = vld [vmem:[#allocation10 + $0xd8] sm:$0xff]  ;;  %v924_v54 = vld [vmem:[#allocation10 + $0xd0] sm:$0xff] }
 0x254   :  { %v737_v57 = vpop.f32.mrf.mxu1  ;;  %v997_v45 = vunpack.c.l.s8.bf16 %v925_v51 }
 0x255   :  { %v768_v58 = vadd.f32 %v761_v52, %v754_v55  ;;  %v755_v61 = vmul.f32 %v751_v53, %v737_v57  ;;  %v1000_v52 = vunpack.c.h.s8.bf16 %v922_v31  ;;  %v1003_v53 = vunpack.c.h.s8.bf16 %v925_v51 }
 0x256   :  { %v739_v62 = vpop.f32.mrf.mxu1  ;;  %v1002_v55 = vunpack.c.h.s8.bf16 %v924_v54  ;;  %v994_v57 = vunpack.c.l.s8.bf16 %v922_v31  ;;  %v1028_v31 = vunpack.c.h.s8.bf16 %v938_v50 }
 0x257   :  { %v769_v0 = vadd.f32 %v765_v56, %v755_v61  ;;  %v770_v1 = vmax.f32 %v768_v58, 0.0  ;;  %1071 = vmatpush2.bf16.msra.mxu1 %v1000_v52  ;;  %v995_v56 = vunpack.c.l.s8.bf16 %v923_v30  ;;  %v996_v58 = vunpack.c.l.s8.bf16 %v924_v54  ;;  %v921_v61 = vld [vmem:[#allocation10 + $0xb8] sm:$0xff] }
 0x258   :  { %v740_v2 = vpop.f32.mrf.mxu1  ;;  %v993_v62 = vunpack.c.h.s8.bf16 %v921_v61  ;;  %v933_v52 = vld [vmem:[#allocation10 + $0x118] sm:$0xff] }
 0x259   :  { %v771_v4 = vmax.f32 %v769_v0, 0.0  ;;  %v772_v7 = vpack.c.bf16 %v770_v1, %v770_v1  ;;  %1072 = vmatprep.subr.bf16.mxu1 %v995_v56  ;;  %v1357_v0 = vld [vmem:[%s1796_s7 + $0x2] sm:$0x3]  ;;  %v1017_v54 = vunpack.c.h.s8.bf16 %v933_v52 }
 0x25a   :  { %v1358_v1 = vld [vmem:[%s1797_s8 + $0x2] sm:$0x3]  ;;  %v870_v2 = vrot.slane %v1357_v0, %v1689_v60 }
 0x25b   :  { %v773_v5 = vpack.c.bf16 %v771_v4, %v771_v4  ;;  %1073 = vmatpush2.bf16.msra.mxu1 %v994_v57  ;;  %v885_v3 = vrot.slane %v1358_v1, %v1689_v60  ;;  %v874_v4 = vrot.slane %v1357_v0, %v1695_v63  ;;  %v1011_v57 = vunpack.c.l.s8.bf16 %v933_v52 }
 0x25c   :  { %1124 = vmatprep.subr.bf16.mxu1 %v993_v62  ;;  %v926_v62 = vld [vmem:[#allocation10 + $0xe0] sm:$0xff] }
 0x25d   :  { %855 = vmatprep.mubr.bf16.mxu0 %v773_v5  ;;  %v1004_v0 = vunpack.c.h.s8.bf16 %v926_v62 }
 0x25e   :  { %856 = vmatmul.mubr.bf16.vlgmr.msra.gmra.mxu0 %v772_v7  ;;  %v889_v7 = vrot.slane %v1358_v1, %v1695_v63 }
 0x25f   :  { %1084 = vmatpush1.bf16.msra.mxu0 %v990_v6 }
 0x260   :  { %1085 = vmatprep.subr.bf16.mxu0 %v985_v9 }
 0x263   :  { %1086 = vmatpush1.bf16.msra.mxu0 %v984_v49 }
 0x264   :  { %1087 = vmatprep.subr.bf16.mxu0 %v979_v10 }
 0x267   :  { %1088 = vmatpush1.bf16.msra.mxu0 %v978_v12 }
 0x268   :  { %1089 = vmatprep.subr.bf16.mxu0 %v973_v13 }
 0x26b   :  { %1090 = vmatpush1.bf16.msra.mxu0 %v972_v15 }
 0x26c   :  { %1091 = vmatprep.subr.bf16.mxu0 %v967_v16 }
 0x26f   :  { %1092 = vmatpush1.bf16.msra.mxu0 %v966_v8 }
 0x270   :  { %1093 = vmatprep.subr.bf16.mxu0 %v961_v18  ;;  %v987_v18 = vunpack.c.l.s8.bf16 %v921_v61 }
 0x273   :  { %1094 = vmatpush1.bf16.msra.mxu0 %v960_v20  ;;  %v986_v20 = vunpack.c.l.s8.bf16 %v920_v14 }
 0x274   :  { %1095 = vmatprep.subr.bf16.mxu0 %v955_v21  ;;  %v981_v21 = vunpack.c.h.s8.bf16 %v915_v19 }
 0x277   :  { %1096 = vmatpush1.bf16.msra.mxu0 %v954_v23  ;;  %v980_v23 = vunpack.c.h.s8.bf16 %v914_v22 }
 0x278   :  { %1097 = vmatprep.subr.bf16.mxu0 %v949_v24  ;;  %v975_v24 = vunpack.c.l.s8.bf16 %v915_v19 }
 0x27b   :  { %1098 = vmatpush1.bf16.msra.mxu0 %v948_v26  ;;  %v974_v26 = vunpack.c.l.s8.bf16 %v914_v22 }
 0x27c   :  { %1099 = vmatprep.subr.bf16.mxu0 %v1039_v27  ;;  %v969_v27 = vunpack.c.h.s8.bf16 %v909_v25 }
 0x27f   :  { %1100 = vmatpush2.bf16.msra.mxu0 %v1038_v29  ;;  %v968_v29 = vunpack.c.h.s8.bf16 %v908_v28 }
 0x280   :  { %1101 = vmatprep.subr.bf16.mxu0 %v1033_v32  ;;  %v963_v32 = vunpack.c.l.s8.bf16 %v909_v25 }
 0x283   :  { %1102 = vmatpush2.bf16.msra.mxu0 %v1032_v34  ;;  %v962_v34 = vunpack.c.l.s8.bf16 %v908_v28  ;;  %v1185_v28 = vsub.s32 4, %v1681_v59 }
 0x284   :  { %1103 = vmatprep.subr.bf16.mxu0 %v1027_v35  ;;  %v957_v35 = vunpack.c.h.s8.bf16 %v903_v33 }
 0x287   :  { %1104 = vmatpush2.bf16.msra.mxu0 %v1026_v37  ;;  %v956_v37 = vunpack.c.h.s8.bf16 %v902_v36 }
 0x288   :  { %1105 = vmatprep.subr.bf16.mxu0 %v1021_v38  ;;  %v951_v38 = vunpack.c.l.s8.bf16 %v903_v33 }
 0x28b   :  { %1106 = vmatpush2.bf16.msra.mxu0 %v1020_v40  ;;  %v950_v40 = vunpack.c.l.s8.bf16 %v902_v36 }
 0x28c   :  { %1107 = vmatprep.subr.bf16.mxu0 %v1015_v41  ;;  %v1041_v41 = vunpack.c.h.s8.bf16 %v945_v39 }
 0x28f   :  { %1108 = vmatpush2.bf16.msra.mxu0 %v1014_v43  ;;  %v1040_v43 = vunpack.c.h.s8.bf16 %v944_v42 }
 0x290   :  { %1109 = vmatprep.subr.bf16.mxu0 %v1009_v47  ;;  %v939_v47 = vld [vmem:[#allocation10 + $0x148] sm:$0xff] }
 0x291   :  { %v1029_v30 = vunpack.c.h.s8.bf16 %v939_v47  ;;  %v1023_v51 = vunpack.c.l.s8.bf16 %v939_v47 }
 0x293   :  { %1110 = vmatpush2.bf16.msra.mxu0 %v1008_v48  ;;  %v1034_v48 = vunpack.c.l.s8.bf16 %v944_v42 }
 0x294   :  { %1111 = vmatprep.subr.bf16.mxu0 %v1003_v53  ;;  %v1022_v53 = vunpack.c.l.s8.bf16 %v938_v50 }
 0x297   :  { %1112 = vmatpush2.bf16.msra.mxu0 %v1002_v55  ;;  %v932_v55 = vld [vmem:[#allocation10 + $0x110] sm:$0xff] }
 0x298   :  { %1113 = vmatprep.subr.bf16.mxu0 %v997_v45  ;;  %v1016_v56 = vunpack.c.h.s8.bf16 %v932_v55  ;;  %v927_v45 = vld [vmem:[#allocation10 + $0xe8] sm:$0xff] }
 0x299   :  { %v1005_v61 = vunpack.c.h.s8.bf16 %v927_v45  ;;  %v999_v1 = vunpack.c.l.s8.bf16 %v927_v45 }
 0x29b   :  { %1114 = vmatpush2.bf16.msra.mxu0 %v996_v58  ;;  %v1010_v58 = vunpack.c.l.s8.bf16 %v932_v55 }
 0x31e   :  { %v857_v5 = vpop.f32.mrf.mxu0 }
 0x31f   :  { %v877_v6 = vmul.f32 %v870_v2, %v857_v5  ;;  %v998_v2 = vunpack.c.l.s8.bf16 %v926_v62  ;;  %v1181_v5 = vsub.s32 3, %v1681_v59 }
 0x320   :  { %v859_v9 = vpop.f32.mrf.mxu0 }
 0x321   :  { %v892_v46 = vadd.f32 %v885_v3, %v877_v6  ;;  %v878_v49 = vmul.f32 %v874_v4, %v859_v9  ;;  %v1177_v3 = vsub.s32 2, %v1681_v59  ;;  %v1165_v4 = vld [vmem:[%s1799_s10] sm:$0x3f]  ;;  %s1530_s10 = smov [#allocation12]  }
 0x322   :  { %v861_v10 = vpop.f32.mrf.mxu0  ;;  %v1203_v6 = vld [vmem:[%s1800_s11] sm:$0x3f]  ;;  %s1253_s11 = sshll.u32 %s1530_s10, 4  ;;  %s1254_s11 = int_to_ptr.vmem [resolvable:$true] %s1253_s11 }
 0x323   :  { %v893_v11 = vadd.f32 %v889_v7, %v878_v49  ;;  %v894_v12 = vmax.f32 %v892_v46, 0.0  ;;  %v1170_v7 = vrot.slane %v1165_v4, %v1689_v60  ;;  %v1178_v9 = vrot.slane %v1165_v4, %v1177_v3  ;;  %s1491_s20 = scalar_lea.vmem %s1254_s11, 768  ;;  %p1496_p0 = scmp.lt.s32.totalorder %s1254_s11, %s1254_s11 }
 0x324   :  { %v862_v13 = vpop.f32.mrf.mxu0  ;;  %v1208_v46 = vrot.slane %v1203_v6, %v1689_v60  ;;  %v1216_v49 = vrot.slane %v1203_v6, %v1177_v3  ;;  %v1174_v10 = vrot.slane %v1165_v4, %v1695_v63  ;;  %p1492_p13 = scmp.ne.s32.totalorder %s1254_s11, %s1491_s20  ;;  %p1497_p1 = scmp.lt.s32.totalorder %s1491_s20, %s1491_s20 }
 0x325   :  { %v895_v15 = vmax.f32 %v893_v11, 0.0  ;;  %v1767_v8 = vpack.c.bf16 %v894_v12, %v894_v12  ;;  %v1182_v11 = vrot.slane %v1165_v4, %v1181_v5 }
 0x326   :  { %p1498_p2 = por %p1497_p1, %p1496_p0 }
 0x327   :  { %v897_v16 = vpack.c.bf16 %v895_v15, %v895_v15 }
 0x328   :  { %p1499_p3 = pnand %p1498_p2, %p1492_p13 }
 0x329   :  { %1074 = vmatprep.mubr.bf16.mxu1 %v897_v16  ;;  %1115 = vmatprep.mubr.bf16.mxu0 %v897_v16 }
 0x32a   :  { %1075 = vmatmul.mubr.bf16.vlgmr.msra.gmra.mxu1 %v1767_v8  ;;  %1116 = vmatmul.mubr.bf16.vlgmr.msra.gmra.mxu0 %v1767_v8 }
 0x32b   :  { %1125 = vmatpush1.bf16.msra.mxu1 %v992_v17  ;;  %1156 = vmatprep.mubr.bf16.mxu1 %v897_v16  ;;  %v1212_v16 = vrot.slane %v1203_v6, %v1695_v63  ;;  %v1220_v17 = vrot.slane %v1203_v6, %v1181_v5  ;;  %v1189_v63 = vsub.s32 5, %v1681_v59 }
 0x32c   :  { %1126 = vmatprep.subr.bf16.mxu1 %v987_v18 }
 0x32d   :  { %v1190_v33 = vrot.slane %v1165_v4, %v1189_v63  ;;  %v1228_v36 = vrot.slane %v1203_v6, %v1189_v63 }
 0x32f   :  { %1127 = vmatpush1.bf16.msra.mxu1 %v986_v20 }
 0x330   :  { %1128 = vmatprep.subr.bf16.mxu1 %v981_v21 }
 0x333   :  { %1129 = vmatpush1.bf16.msra.mxu1 %v980_v23 }
 0x334   :  { %1130 = vmatprep.subr.bf16.mxu1 %v975_v24 }
 0x337   :  { %1131 = vmatpush1.bf16.msra.mxu1 %v974_v26 }
 0x338   :  { %1132 = vmatprep.subr.bf16.mxu1 %v969_v27 }
 0x33b   :  { %1133 = vmatpush1.bf16.msra.mxu1 %v968_v29  ;;  %v1186_v29 = vrot.slane %v1165_v4, %v1185_v28 }
 0x33c   :  { %1134 = vmatprep.subr.bf16.mxu1 %v963_v32  ;;  %v1224_v32 = vrot.slane %v1203_v6, %v1185_v28 }
 0x33f   :  { %1135 = vmatpush1.bf16.msra.mxu1 %v962_v34 }
 0x340   :  { %1136 = vmatprep.subr.bf16.mxu1 %v957_v35 }
 0x343   :  { %1137 = vmatpush1.bf16.msra.mxu1 %v956_v37 }
 0x344   :  { %1138 = vmatprep.subr.bf16.mxu1 %v951_v38 }
 0x347   :  { %1139 = vmatpush1.bf16.msra.mxu1 %v950_v40 }
 0x348   :  { %1140 = vmatprep.subr.bf16.mxu1 %v1041_v41 }
 0x34b   :  { %1141 = vmatpush2.bf16.msra.mxu1 %v1040_v43 }
 0x34c   :  { %1142 = vmatprep.subr.bf16.mxu1 %v1035_v44 }
 0x34f   :  { %1143 = vmatpush2.bf16.msra.mxu1 %v1034_v48 }
 0x350   :  { %1144 = vmatprep.subr.bf16.mxu1 %v1029_v30 }
 0x353   :  { %1145 = vmatpush2.bf16.msra.mxu1 %v1028_v31 }
 0x354   :  { %1146 = vmatprep.subr.bf16.mxu1 %v1023_v51 }
 0x357   :  { %1147 = vmatpush2.bf16.msra.mxu1 %v1022_v53 }
 0x358   :  { %1148 = vmatprep.subr.bf16.mxu1 %v1017_v54 }
 0x35b   :  { %1149 = vmatpush2.bf16.msra.mxu1 %v1016_v56 }
 0x35c   :  { %1150 = vmatprep.subr.bf16.mxu1 %v1011_v57 }
 0x35f   :  { %1151 = vmatpush2.bf16.msra.mxu1 %v1010_v58 }
 0x360   :  { %1152 = vmatprep.subr.bf16.mxu1 %v1005_v61 }
 0x363   :  { %1153 = vmatpush2.bf16.msra.mxu1 %v1004_v0 }
 0x364   :  { %1154 = vmatprep.subr.bf16.mxu1 %v999_v1 }
 0x367   :  { %1155 = vmatpush2.bf16.msra.mxu1 %v998_v2 }
 0x36a   :  { %1157 = vmatmul.mubr.bf16.vlgmr.msra.gmra.mxu1 %v1767_v8 }
 0x3ea   :  { %v1076_v12 = vpop.f32.mrf.mxu1  ;;  %v1117_v13 = vpop.f32.mrf.mxu0 }
 0x3eb   :  { %v1197_v14 = vmul.f32 %v1170_v7, %v1076_v12  ;;  %v1199_v15 = vmul.f32 %v1178_v9, %v1117_v13 }
 0x3ec   :  { %v1078_v8 = vpop.f32.mrf.mxu1  ;;  %v1119_v18 = vpop.f32.mrf.mxu0 }
 0x3ed   :  { %v1235_v19 = vadd.f32 %v1208_v46, %v1197_v14  ;;  %v1237_v20 = vadd.f32 %v1216_v49, %v1199_v15  ;;  %v1198_v21 = vmul.f32 %v1174_v10, %v1078_v8  ;;  %v1200_v22 = vmul.f32 %v1182_v11, %v1119_v18 }
 0x3ee   :  { %v1080_v23 = vpop.f32.mrf.mxu1  ;;  %v1121_v24 = vpop.f32.mrf.mxu0 }
 0x3ef   :  { %1241 = vst [vmem:[#allocation12] sm:$0xff] %v1235_v19  ;;  %1243 = vst [vmem:[#allocation12 + $0x10] sm:$0xff] %v1237_v20  ;;  %v1236_v60 = vadd.f32 %v1212_v16, %v1198_v21  ;;  %v1238_v25 = vadd.f32 %v1220_v17, %v1200_v22 }
 0x3f0   :  { %v1081_v26 = vpop.f32.mrf.mxu1  ;;  %v1122_v27 = vpop.f32.mrf.mxu0 }
 0x3f1   :  { %1242 = vst [vmem:[#allocation12 + $0x8] sm:$0xff] %v1236_v60  ;;  %1244 = vst [vmem:[#allocation12 + $0x18] sm:$0xff] %v1238_v25 }
 0x42a   :  { %v1158_v34 = vpop.f32.mrf.mxu1 }
 0x42b   :  { %v1201_v35 = vmul.f32 %v1186_v29, %v1158_v34 }
 0x42c   :  { %v1160_v37 = vpop.f32.mrf.mxu1 }
 0x42d   :  { %v1239_v38 = vadd.f32 %v1224_v32, %v1201_v35  ;;  %v1202_v39 = vmul.f32 %v1190_v33, %v1160_v37 }
 0x42e   :  { %v1162_v40 = vpop.f32.mrf.mxu1 }
 0x42f   :  { %1245 = vst [vmem:[#allocation12 + $0x20] sm:$0xff] %v1239_v38  ;;  %v1240_v41 = vadd.f32 %v1228_v36, %v1202_v39 }
 0x430   :  { %v1163_v42 = vpop.f32.mrf.mxu1 }
 0x431   :  { %1246 = vst [vmem:[#allocation12 + $0x28] sm:$0xff] %v1240_v41 }
 0x432   :  { %1502 = shalt.err (!%p1499_p3)
}
 0x433   :  { %1256 = dma.vmem_to_hbm [thread:$0]  %s1254_s11, 768, %s1801_s12, [#allocation6]  }
 0x434   :  { %1519 = dma.done.wait [#allocation6], 768  }
 0x435   :  { %1520 = vsyncadd [#allocation6], 4294966528 }
 0x436   :  { %1260 = vsyncpa [#allocation5], 1 }
 0x437   :  { %1261 = vsyncpa [#allocation8], 1 }
 0x438   :  { %1262 = vsyncpa [#allocation11], 1 }
 0x439   :  { %1263 = vsyncpa [#allocation6], 1 }

</bundles_post_ra>
